<compile_context>
chip_gen: v5e
topology: v5e:2x2
jax: 0.10.0
libtpu: 0.0.40
codegen_flags: <defaults>
</compile_context>

<pallas_src>
import functools

import jax
import jax.numpy as jnp
from jax.experimental import pallas as pl
from jax.experimental.pallas import tpu as pltpu

N_IN, H1, H2, N_OUT = 2, 10, 10, 1

# Flat-parameter packing offsets (weights row-major in PyTorch [out, in] layout, then bias).
W1_OFF = 0
B1_OFF = W1_OFF + H1 * N_IN          # 20
W2_OFF = B1_OFF + H1                 # 30
B2_OFF = W2_OFF + H2 * H1            # 130
W3_OFF = B2_OFF + H2                 # 140
B3_OFF = W3_OFF + N_OUT * H2         # 150
N_PARAMS = B3_OFF + N_OUT            # 151


def _mlp_kernel(p_ref, x_ref, o_ref):
    # p_ref: f32[151] in SMEM.  x_ref: [2, block_b] VMEM (feature-major, batch on lanes).
    # o_ref: [1, block_b] VMEM (lane-dense output tile).
    x = [x_ref[pl.ds(i, 1), :] for i in range(N_IN)]          # each [1, block_b]

    def layer(inp, w_off, b_off, n_out, n_in):
        # Unrolled VPU broadcast-FMA: out[o] = b[o] + sum_i w[o, i] * inp[i]
        out = []
        for o in range(n_out):
            acc = p_ref[b_off + o] + p_ref[w_off + o * n_in] * inp[0]
            for i in range(1, n_in):
                acc = acc + p_ref[w_off + o * n_in + i] * inp[i]
            out.append(acc)
        return out

    h1 = layer(x, W1_OFF, B1_OFF, H1, N_IN)
    h2 = layer(h1, W2_OFF, B2_OFF, H2, H1)
    h3 = layer(h2, W3_OFF, B3_OFF, N_OUT, H2)

    o_ref[...] = h3[0].astype(o_ref.dtype)


def _pack_params(params):
    w1, b1, w2, b2, w3, b3 = params
    return jnp.concatenate([
        w1.reshape(-1), b1.reshape(-1),
        w2.reshape(-1), b2.reshape(-1),
        w3.reshape(-1), b3.reshape(-1),
    ]).astype(jnp.float32)


@functools.partial(jax.jit, static_argnames=("block_b",))
def circle_model_v2(x, params, *, block_b=256):
    """x: [N, 2] float32 (batch-major, like the PyTorch module).
    params: PyTorch-layout (w1[10,2], b1[10], w2[10,10], b2[10], w3[1,10], b3[1]).
    Returns logits [N, 1] float32 (no final activation, matching forward())."""
    n, d_in = x.shape
    assert d_in == N_IN
    assert block_b % 128 == 0, "block_b must be a multiple of 128 (lane width)"

    flat_p = _pack_params(params)

    # Feature-major so batch sits on the lane axis; pad batch up to a tile multiple.
    n_pad = pl.cdiv(n, block_b) * block_b
    xt = x.T.astype(jnp.float32)                               # [2, N]
    if n_pad != n:
        xt = jnp.pad(xt, ((0, 0), (0, n_pad - n)))

    grid = (n_pad // block_b,)
    flops = 2 * n_pad * (N_IN * H1 + H1 * H2 + H2 * N_OUT)
    bytes_accessed = 4 * (N_IN * n_pad + N_OUT * n_pad + N_PARAMS)

    out = pl.pallas_call(
        _mlp_kernel,
        out_shape=jax.ShapeDtypeStruct((N_OUT, n_pad), jnp.float32),
        grid_spec=pltpu.PrefetchScalarGridSpec(
            num_scalar_prefetch=0,
            grid=grid,
            in_specs=[
                # All 151 params resident in SMEM: one buffer, no per-step DMA churn.
                pl.BlockSpec(memory_space=pltpu.MemorySpace.SMEM),
                # Lane-dense input tile: [2, block_b], batch on lanes.
                pl.BlockSpec((N_IN, block_b), lambda i: (0, i)),
            ],
            out_specs=pl.BlockSpec((N_OUT, block_b), lambda i: (0, i)),
        ),
        compiler_params=pltpu.CompilerParams(
            dimension_semantics=("parallel",),
        ),
        cost_estimate=pl.CostEstimate(
            flops=flops, transcendentals=0, bytes_accessed=bytes_accessed),
    )(flat_p, xt)

    return out[:, :n].T                                        # [N, 1]


def init_params(key):
    """Deterministic init matching the nn.Linear shapes of CircleModelV2
    (PyTorch layout: weight [out, in], bias [out])."""
    def linear(k, fan_in, fan_out):
        kw, kb = jax.random.split(k)
        bound = 1.0 / jnp.sqrt(jnp.float32(fan_in))            # PyTorch default uniform bound
        w = jax.random.uniform(kw, (fan_out, fan_in), jnp.float32, -bound, bound)
        b = jax.random.uniform(kb, (fan_out,), jnp.float32, -bound, bound)
        return w, b

    k1, k2, k3 = jax.random.split(key, 3)
    w1, b1 = linear(k1, N_IN, H1)
    w2, b2 = linear(k2, H1, H2)
    w3, b3 = linear(k3, H2, N_OUT)
    return (w1, b1, w2, b2, w3, b3)


def reference(x, params):
    w1, b1, w2, b2, w3, b3 = params
    hp = jax.lax.Precision.HIGHEST
    h = jnp.dot(x, w1.T, precision=hp) + b1
    h = jnp.dot(h, w2.T, precision=hp) + b2
    return jnp.dot(h, w3.T, precision=hp) + b3


if __name__ == "__main__":
    key = jax.random.PRNGKey(0)
    k_param, k_x = jax.random.split(key)
    params = init_params(k_param)

    # 512 2-D points: still tiny in bytes, but enough for lane-dense 128-wide tiles
    # and >= 2 parallel grid steps (v7x has 2 TensorCores per chip).
    n = 512
    x = jax.random.normal(k_x, (n, 2), dtype=jnp.float32)

    out = circle_model_v2(x, params, block_b=256)
    out = jax.block_until_ready(out)
    ref = reference(x, params)
    assert out.shape == (n, 1), out.shape
    assert jnp.allclose(out, ref, atol=1e-4, rtol=1e-4), float(jnp.max(jnp.abs(out - ref)))

    # Non-multiple batch exercises the cdiv + zero-pad path.
    x2 = x[:300]
    out2 = jax.block_until_ready(circle_model_v2(x2, params, block_b=256))
    ref2 = reference(x2, params)
    assert out2.shape == (300, 1), out2.shape
    assert jnp.allclose(out2, ref2, atol=1e-4, rtol=1e-4)

    print("KERNEL_OK")
</pallas_src>

<mosaic_0001>
module attributes {stable_mosaic.version = 11 : i64} {
  func.func @_mlp_kernel(%arg0: i32, %arg1: memref<151xf32, #tpu.memory_space<smem>>, %arg2: memref<2x256xf32, #tpu.memory_space<vmem>>, %arg3: memref<1x256xf32, #tpu.memory_space<vmem>>) attributes {dimension_semantics = [#tpu.dimension_semantics<parallel>], iteration_bounds = array<i64: 2>, scalar_prefetch = 0 : i64, scratch_operands = 0 : i64, tpu.core_type = #tpu.core_type<tc>, window_params = [{transform_indices = @transform_0, window_bounds = array<i64: 151>}, {transform_indices = @transform_1, window_bounds = array<i64: 2, 256>}, {transform_indices = @transform_2, window_bounds = array<i64: 1, 256>}]} {
    %c0 = arith.constant 0 : index
    %c0_0 = arith.constant 0 : index
    %0 = vector.load %arg2[%c0, %c0_0] : memref<2x256xf32, #tpu.memory_space<vmem>>, vector<1x256xf32>
    %c1 = arith.constant 1 : index
    %c0_1 = arith.constant 0 : index
    %1 = vector.load %arg2[%c1, %c0_1] : memref<2x256xf32, #tpu.memory_space<vmem>>, vector<1x256xf32>
    %c20 = arith.constant 20 : index
    %2 = memref.load %arg1[%c20] : memref<151xf32, #tpu.memory_space<smem>>
    %c0_2 = arith.constant 0 : index
    %3 = memref.load %arg1[%c0_2] : memref<151xf32, #tpu.memory_space<smem>>
    %4 = vector.broadcast %3 : f32 to vector<1x256xf32>
    %5 = arith.mulf %4, %0 : vector<1x256xf32>
    %6 = vector.broadcast %2 : f32 to vector<1x256xf32>
    %7 = arith.addf %6, %5 : vector<1x256xf32>
    %c1_3 = arith.constant 1 : index
    %8 = memref.load %arg1[%c1_3] : memref<151xf32, #tpu.memory_space<smem>>
    %9 = vector.broadcast %8 : f32 to vector<1x256xf32>
    %10 = arith.mulf %9, %1 : vector<1x256xf32>
    %11 = arith.addf %7, %10 : vector<1x256xf32>
    %c21 = arith.constant 21 : index
    %12 = memref.load %arg1[%c21] : memref<151xf32, #tpu.memory_space<smem>>
    %c2 = arith.constant 2 : index
    %13 = memref.load %arg1[%c2] : memref<151xf32, #tpu.memory_space<smem>>
    %14 = vector.broadcast %13 : f32 to vector<1x256xf32>
    %15 = arith.mulf %14, %0 : vector<1x256xf32>
    %16 = vector.broadcast %12 : f32 to vector<1x256xf32>
    %17 = arith.addf %16, %15 : vector<1x256xf32>
    %c3 = arith.constant 3 : index
    %18 = memref.load %arg1[%c3] : memref<151xf32, #tpu.memory_space<smem>>
    %19 = vector.broadcast %18 : f32 to vector<1x256xf32>
    %20 = arith.mulf %19, %1 : vector<1x256xf32>
    %21 = arith.addf %17, %20 : vector<1x256xf32>
    %c22 = arith.constant 22 : index
    %22 = memref.load %arg1[%c22] : memref<151xf32, #tpu.memory_space<smem>>
    %c4 = arith.constant 4 : index
    %23 = memref.load %arg1[%c4] : memref<151xf32, #tpu.memory_space<smem>>
    %24 = vector.broadcast %23 : f32 to vector<1x256xf32>
    %25 = arith.mulf %24, %0 : vector<1x256xf32>
    %26 = vector.broadcast %22 : f32 to vector<1x256xf32>
    %27 = arith.addf %26, %25 : vector<1x256xf32>
    %c5 = arith.constant 5 : index
    %28 = memref.load %arg1[%c5] : memref<151xf32, #tpu.memory_space<smem>>
    %29 = vector.broadcast %28 : f32 to vector<1x256xf32>
    %30 = arith.mulf %29, %1 : vector<1x256xf32>
    %31 = arith.addf %27, %30 : vector<1x256xf32>
    %c23 = arith.constant 23 : index
    %32 = memref.load %arg1[%c23] : memref<151xf32, #tpu.memory_space<smem>>
    %c6 = arith.constant 6 : index
    %33 = memref.load %arg1[%c6] : memref<151xf32, #tpu.memory_space<smem>>
    %34 = vector.broadcast %33 : f32 to vector<1x256xf32>
    %35 = arith.mulf %34, %0 : vector<1x256xf32>
    %36 = vector.broadcast %32 : f32 to vector<1x256xf32>
    %37 = arith.addf %36, %35 : vector<1x256xf32>
    %c7 = arith.constant 7 : index
    %38 = memref.load %arg1[%c7] : memref<151xf32, #tpu.memory_space<smem>>
    %39 = vector.broadcast %38 : f32 to vector<1x256xf32>
    %40 = arith.mulf %39, %1 : vector<1x256xf32>
    %41 = arith.addf %37, %40 : vector<1x256xf32>
    %c24 = arith.constant 24 : index
    %42 = memref.load %arg1[%c24] : memref<151xf32, #tpu.memory_space<smem>>
    %c8 = arith.constant 8 : index
    %43 = memref.load %arg1[%c8] : memref<151xf32, #tpu.memory_space<smem>>
    %44 = vector.broadcast %43 : f32 to vector<1x256xf32>
    %45 = arith.mulf %44, %0 : vector<1x256xf32>
    %46 = vector.broadcast %42 : f32 to vector<1x256xf32>
    %47 = arith.addf %46, %45 : vector<1x256xf32>
    %c9 = arith.constant 9 : index
    %48 = memref.load %arg1[%c9] : memref<151xf32, #tpu.memory_space<smem>>
    %49 = vector.broadcast %48 : f32 to vector<1x256xf32>
    %50 = arith.mulf %49, %1 : vector<1x256xf32>
    %51 = arith.addf %47, %50 : vector<1x256xf32>
    %c25 = arith.constant 25 : index
    %52 = memref.load %arg1[%c25] : memref<151xf32, #tpu.memory_space<smem>>
    %c10 = arith.constant 10 : index
    %53 = memref.load %arg1[%c10] : memref<151xf32, #tpu.memory_space<smem>>
    %54 = vector.broadcast %53 : f32 to vector<1x256xf32>
    %55 = arith.mulf %54, %0 : vector<1x256xf32>
    %56 = vector.broadcast %52 : f32 to vector<1x256xf32>
    %57 = arith.addf %56, %55 : vector<1x256xf32>
    %c11 = arith.constant 11 : index
    %58 = memref.load %arg1[%c11] : memref<151xf32, #tpu.memory_space<smem>>
    %59 = vector.broadcast %58 : f32 to vector<1x256xf32>
    %60 = arith.mulf %59, %1 : vector<1x256xf32>
    %61 = arith.addf %57, %60 : vector<1x256xf32>
    %c26 = arith.constant 26 : index
    %62 = memref.load %arg1[%c26] : memref<151xf32, #tpu.memory_space<smem>>
    %c12 = arith.constant 12 : index
    %63 = memref.load %arg1[%c12] : memref<151xf32, #tpu.memory_space<smem>>
    %64 = vector.broadcast %63 : f32 to vector<1x256xf32>
    %65 = arith.mulf %64, %0 : vector<1x256xf32>
    %66 = vector.broadcast %62 : f32 to vector<1x256xf32>
    %67 = arith.addf %66, %65 : vector<1x256xf32>
    %c13 = arith.constant 13 : index
    %68 = memref.load %arg1[%c13] : memref<151xf32, #tpu.memory_space<smem>>
    %69 = vector.broadcast %68 : f32 to vector<1x256xf32>
    %70 = arith.mulf %69, %1 : vector<1x256xf32>
    %71 = arith.addf %67, %70 : vector<1x256xf32>
    %c27 = arith.constant 27 : index
    %72 = memref.load %arg1[%c27] : memref<151xf32, #tpu.memory_space<smem>>
    %c14 = arith.constant 14 : index
    %73 = memref.load %arg1[%c14] : memref<151xf32, #tpu.memory_space<smem>>
    %74 = vector.broadcast %73 : f32 to vector<1x256xf32>
    %75 = arith.mulf %74, %0 : vector<1x256xf32>
    %76 = vector.broadcast %72 : f32 to vector<1x256xf32>
    %77 = arith.addf %76, %75 : vector<1x256xf32>
    %c15 = arith.constant 15 : index
    %78 = memref.load %arg1[%c15] : memref<151xf32, #tpu.memory_space<smem>>
    %79 = vector.broadcast %78 : f32 to vector<1x256xf32>
    %80 = arith.mulf %79, %1 : vector<1x256xf32>
    %81 = arith.addf %77, %80 : vector<1x256xf32>
    %c28 = arith.constant 28 : index
    %82 = memref.load %arg1[%c28] : memref<151xf32, #tpu.memory_space<smem>>
    %c16 = arith.constant 16 : index
    %83 = memref.load %arg1[%c16] : memref<151xf32, #tpu.memory_space<smem>>
    %84 = vector.broadcast %83 : f32 to vector<1x256xf32>
    %85 = arith.mulf %84, %0 : vector<1x256xf32>
    %86 = vector.broadcast %82 : f32 to vector<1x256xf32>
    %87 = arith.addf %86, %85 : vector<1x256xf32>
    %c17 = arith.constant 17 : index
    %88 = memref.load %arg1[%c17] : memref<151xf32, #tpu.memory_space<smem>>
    %89 = vector.broadcast %88 : f32 to vector<1x256xf32>
    %90 = arith.mulf %89, %1 : vector<1x256xf32>
    %91 = arith.addf %87, %90 : vector<1x256xf32>
    %c29 = arith.constant 29 : index
    %92 = memref.load %arg1[%c29] : memref<151xf32, #tpu.memory_space<smem>>
    %c18 = arith.constant 18 : index
    %93 = memref.load %arg1[%c18] : memref<151xf32, #tpu.memory_space<smem>>
    %94 = vector.broadcast %93 : f32 to vector<1x256xf32>
    %95 = arith.mulf %94, %0 : vector<1x256xf32>
    %96 = vector.broadcast %92 : f32 to vector<1x256xf32>
    %97 = arith.addf %96, %95 : vector<1x256xf32>
    %c19 = arith.constant 19 : index
    %98 = memref.load %arg1[%c19] : memref<151xf32, #tpu.memory_space<smem>>
    %99 = vector.broadcast %98 : f32 to vector<1x256xf32>
    %100 = arith.mulf %99, %1 : vector<1x256xf32>
    %101 = arith.addf %97, %100 : vector<1x256xf32>
    %c130 = arith.constant 130 : index
    %102 = memref.load %arg1[%c130] : memref<151xf32, #tpu.memory_space<smem>>
    %c30 = arith.constant 30 : index
    %103 = memref.load %arg1[%c30] : memref<151xf32, #tpu.memory_space<smem>>
    %104 = vector.broadcast %103 : f32 to vector<1x256xf32>
    %105 = arith.mulf %104, %11 : vector<1x256xf32>
    %106 = vector.broadcast %102 : f32 to vector<1x256xf32>
    %107 = arith.addf %106, %105 : vector<1x256xf32>
    %c31 = arith.constant 31 : index
    %108 = memref.load %arg1[%c31] : memref<151xf32, #tpu.memory_space<smem>>
    %109 = vector.broadcast %108 : f32 to vector<1x256xf32>
    %110 = arith.mulf %109, %21 : vector<1x256xf32>
    %111 = arith.addf %107, %110 : vector<1x256xf32>
    %c32 = arith.constant 32 : index
    %112 = memref.load %arg1[%c32] : memref<151xf32, #tpu.memory_space<smem>>
    %113 = vector.broadcast %112 : f32 to vector<1x256xf32>
    %114 = arith.mulf %113, %31 : vector<1x256xf32>
    %115 = arith.addf %111, %114 : vector<1x256xf32>
    %c33 = arith.constant 33 : index
    %116 = memref.load %arg1[%c33] : memref<151xf32, #tpu.memory_space<smem>>
    %117 = vector.broadcast %116 : f32 to vector<1x256xf32>
    %118 = arith.mulf %117, %41 : vector<1x256xf32>
    %119 = arith.addf %115, %118 : vector<1x256xf32>
    %c34 = arith.constant 34 : index
    %120 = memref.load %arg1[%c34] : memref<151xf32, #tpu.memory_space<smem>>
    %121 = vector.broadcast %120 : f32 to vector<1x256xf32>
    %122 = arith.mulf %121, %51 : vector<1x256xf32>
    %123 = arith.addf %119, %122 : vector<1x256xf32>
    %c35 = arith.constant 35 : index
    %124 = memref.load %arg1[%c35] : memref<151xf32, #tpu.memory_space<smem>>
    %125 = vector.broadcast %124 : f32 to vector<1x256xf32>
    %126 = arith.mulf %125, %61 : vector<1x256xf32>
    %127 = arith.addf %123, %126 : vector<1x256xf32>
    %c36 = arith.constant 36 : index
    %128 = memref.load %arg1[%c36] : memref<151xf32, #tpu.memory_space<smem>>
    %129 = vector.broadcast %128 : f32 to vector<1x256xf32>
    %130 = arith.mulf %129, %71 : vector<1x256xf32>
    %131 = arith.addf %127, %130 : vector<1x256xf32>
    %c37 = arith.constant 37 : index
    %132 = memref.load %arg1[%c37] : memref<151xf32, #tpu.memory_space<smem>>
    %133 = vector.broadcast %132 : f32 to vector<1x256xf32>
    %134 = arith.mulf %133, %81 : vector<1x256xf32>
    %135 = arith.addf %131, %134 : vector<1x256xf32>
    %c38 = arith.constant 38 : index
    %136 = memref.load %arg1[%c38] : memref<151xf32, #tpu.memory_space<smem>>
    %137 = vector.broadcast %136 : f32 to vector<1x256xf32>
    %138 = arith.mulf %137, %91 : vector<1x256xf32>
    %139 = arith.addf %135, %138 : vector<1x256xf32>
    %c39 = arith.constant 39 : index
    %140 = memref.load %arg1[%c39] : memref<151xf32, #tpu.memory_space<smem>>
    %141 = vector.broadcast %140 : f32 to vector<1x256xf32>
    %142 = arith.mulf %141, %101 : vector<1x256xf32>
    %143 = arith.addf %139, %142 : vector<1x256xf32>
    %c131 = arith.constant 131 : index
    %144 = memref.load %arg1[%c131] : memref<151xf32, #tpu.memory_space<smem>>
    %c40 = arith.constant 40 : index
    %145 = memref.load %arg1[%c40] : memref<151xf32, #tpu.memory_space<smem>>
    %146 = vector.broadcast %145 : f32 to vector<1x256xf32>
    %147 = arith.mulf %146, %11 : vector<1x256xf32>
    %148 = vector.broadcast %144 : f32 to vector<1x256xf32>
    %149 = arith.addf %148, %147 : vector<1x256xf32>
    %c41 = arith.constant 41 : index
    %150 = memref.load %arg1[%c41] : memref<151xf32, #tpu.memory_space<smem>>
    %151 = vector.broadcast %150 : f32 to vector<1x256xf32>
    %152 = arith.mulf %151, %21 : vector<1x256xf32>
    %153 = arith.addf %149, %152 : vector<1x256xf32>
    %c42 = arith.constant 42 : index
    %154 = memref.load %arg1[%c42] : memref<151xf32, #tpu.memory_space<smem>>
    %155 = vector.broadcast %154 : f32 to vector<1x256xf32>
    %156 = arith.mulf %155, %31 : vector<1x256xf32>
    %157 = arith.addf %153, %156 : vector<1x256xf32>
    %c43 = arith.constant 43 : index
    %158 = memref.load %arg1[%c43] : memref<151xf32, #tpu.memory_space<smem>>
    %159 = vector.broadcast %158 : f32 to vector<1x256xf32>
    %160 = arith.mulf %159, %41 : vector<1x256xf32>
    %161 = arith.addf %157, %160 : vector<1x256xf32>
    %c44 = arith.constant 44 : index
    %162 = memref.load %arg1[%c44] : memref<151xf32, #tpu.memory_space<smem>>
    %163 = vector.broadcast %162 : f32 to vector<1x256xf32>
    %164 = arith.mulf %163, %51 : vector<1x256xf32>
    %165 = arith.addf %161, %164 : vector<1x256xf32>
    %c45 = arith.constant 45 : index
    %166 = memref.load %arg1[%c45] : memref<151xf32, #tpu.memory_space<smem>>
    %167 = vector.broadcast %166 : f32 to vector<1x256xf32>
    %168 = arith.mulf %167, %61 : vector<1x256xf32>
    %169 = arith.addf %165, %168 : vector<1x256xf32>
    %c46 = arith.constant 46 : index
    %170 = memref.load %arg1[%c46] : memref<151xf32, #tpu.memory_space<smem>>
    %171 = vector.broadcast %170 : f32 to vector<1x256xf32>
    %172 = arith.mulf %171, %71 : vector<1x256xf32>
    %173 = arith.addf %169, %172 : vector<1x256xf32>
    %c47 = arith.constant 47 : index
    %174 = memref.load %arg1[%c47] : memref<151xf32, #tpu.memory_space<smem>>
    %175 = vector.broadcast %174 : f32 to vector<1x256xf32>
    %176 = arith.mulf %175, %81 : vector<1x256xf32>
    %177 = arith.addf %173, %176 : vector<1x256xf32>
    %c48 = arith.constant 48 : index
    %178 = memref.load %arg1[%c48] : memref<151xf32, #tpu.memory_space<smem>>
    %179 = vector.broadcast %178 : f32 to vector<1x256xf32>
    %180 = arith.mulf %179, %91 : vector<1x256xf32>
    %181 = arith.addf %177, %180 : vector<1x256xf32>
    %c49 = arith.constant 49 : index
    %182 = memref.load %arg1[%c49] : memref<151xf32, #tpu.memory_space<smem>>
    %183 = vector.broadcast %182 : f32 to vector<1x256xf32>
    %184 = arith.mulf %183, %101 : vector<1x256xf32>
    %185 = arith.addf %181, %184 : vector<1x256xf32>
    %c132 = arith.constant 132 : index
    %186 = memref.load %arg1[%c132] : memref<151xf32, #tpu.memory_space<smem>>
    %c50 = arith.constant 50 : index
    %187 = memref.load %arg1[%c50] : memref<151xf32, #tpu.memory_space<smem>>
    %188 = vector.broadcast %187 : f32 to vector<1x256xf32>
    %189 = arith.mulf %188, %11 : vector<1x256xf32>
    %190 = vector.broadcast %186 : f32 to vector<1x256xf32>
    %191 = arith.addf %190, %189 : vector<1x256xf32>
    %c51 = arith.constant 51 : index
    %192 = memref.load %arg1[%c51] : memref<151xf32, #tpu.memory_space<smem>>
    %193 = vector.broadcast %192 : f32 to vector<1x256xf32>
    %194 = arith.mulf %193, %21 : vector<1x256xf32>
    %195 = arith.addf %191, %194 : vector<1x256xf32>
    %c52 = arith.constant 52 : index
    %196 = memref.load %arg1[%c52] : memref<151xf32, #tpu.memory_space<smem>>
    %197 = vector.broadcast %196 : f32 to vector<1x256xf32>
    %198 = arith.mulf %197, %31 : vector<1x256xf32>
    %199 = arith.addf %195, %198 : vector<1x256xf32>
    %c53 = arith.constant 53 : index
    %200 = memref.load %arg1[%c53] : memref<151xf32, #tpu.memory_space<smem>>
    %201 = vector.broadcast %200 : f32 to vector<1x256xf32>
    %202 = arith.mulf %201, %41 : vector<1x256xf32>
    %203 = arith.addf %199, %202 : vector<1x256xf32>
    %c54 = arith.constant 54 : index
    %204 = memref.load %arg1[%c54] : memref<151xf32, #tpu.memory_space<smem>>
    %205 = vector.broadcast %204 : f32 to vector<1x256xf32>
    %206 = arith.mulf %205, %51 : vector<1x256xf32>
    %207 = arith.addf %203, %206 : vector<1x256xf32>
    %c55 = arith.constant 55 : index
    %208 = memref.load %arg1[%c55] : memref<151xf32, #tpu.memory_space<smem>>
    %209 = vector.broadcast %208 : f32 to vector<1x256xf32>
    %210 = arith.mulf %209, %61 : vector<1x256xf32>
    %211 = arith.addf %207, %210 : vector<1x256xf32>
    %c56 = arith.constant 56 : index
    %212 = memref.load %arg1[%c56] : memref<151xf32, #tpu.memory_space<smem>>
    %213 = vector.broadcast %212 : f32 to vector<1x256xf32>
    %214 = arith.mulf %213, %71 : vector<1x256xf32>
    %215 = arith.addf %211, %214 : vector<1x256xf32>
    %c57 = arith.constant 57 : index
    %216 = memref.load %arg1[%c57] : memref<151xf32, #tpu.memory_space<smem>>
    %217 = vector.broadcast %216 : f32 to vector<1x256xf32>
    %218 = arith.mulf %217, %81 : vector<1x256xf32>
    %219 = arith.addf %215, %218 : vector<1x256xf32>
    %c58 = arith.constant 58 : index
    %220 = memref.load %arg1[%c58] : memref<151xf32, #tpu.memory_space<smem>>
    %221 = vector.broadcast %220 : f32 to vector<1x256xf32>
    %222 = arith.mulf %221, %91 : vector<1x256xf32>
    %223 = arith.addf %219, %222 : vector<1x256xf32>
    %c59 = arith.constant 59 : index
    %224 = memref.load %arg1[%c59] : memref<151xf32, #tpu.memory_space<smem>>
    %225 = vector.broadcast %224 : f32 to vector<1x256xf32>
    %226 = arith.mulf %225, %101 : vector<1x256xf32>
    %227 = arith.addf %223, %226 : vector<1x256xf32>
    %c133 = arith.constant 133 : index
    %228 = memref.load %arg1[%c133] : memref<151xf32, #tpu.memory_space<smem>>
    %c60 = arith.constant 60 : index
    %229 = memref.load %arg1[%c60] : memref<151xf32, #tpu.memory_space<smem>>
    %230 = vector.broadcast %229 : f32 to vector<1x256xf32>
    %231 = arith.mulf %230, %11 : vector<1x256xf32>
    %232 = vector.broadcast %228 : f32 to vector<1x256xf32>
    %233 = arith.addf %232, %231 : vector<1x256xf32>
    %c61 = arith.constant 61 : index
    %234 = memref.load %arg1[%c61] : memref<151xf32, #tpu.memory_space<smem>>
    %235 = vector.broadcast %234 : f32 to vector<1x256xf32>
    %236 = arith.mulf %235, %21 : vector<1x256xf32>
    %237 = arith.addf %233, %236 : vector<1x256xf32>
    %c62 = arith.constant 62 : index
    %238 = memref.load %arg1[%c62] : memref<151xf32, #tpu.memory_space<smem>>
    %239 = vector.broadcast %238 : f32 to vector<1x256xf32>
    %240 = arith.mulf %239, %31 : vector<1x256xf32>
    %241 = arith.addf %237, %240 : vector<1x256xf32>
    %c63 = arith.constant 63 : index
    %242 = memref.load %arg1[%c63] : memref<151xf32, #tpu.memory_space<smem>>
    %243 = vector.broadcast %242 : f32 to vector<1x256xf32>
    %244 = arith.mulf %243, %41 : vector<1x256xf32>
    %245 = arith.addf %241, %244 : vector<1x256xf32>
    %c64 = arith.constant 64 : index
    %246 = memref.load %arg1[%c64] : memref<151xf32, #tpu.memory_space<smem>>
    %247 = vector.broadcast %246 : f32 to vector<1x256xf32>
    %248 = arith.mulf %247, %51 : vector<1x256xf32>
    %249 = arith.addf %245, %248 : vector<1x256xf32>
    %c65 = arith.constant 65 : index
    %250 = memref.load %arg1[%c65] : memref<151xf32, #tpu.memory_space<smem>>
    %251 = vector.broadcast %250 : f32 to vector<1x256xf32>
    %252 = arith.mulf %251, %61 : vector<1x256xf32>
    %253 = arith.addf %249, %252 : vector<1x256xf32>
    %c66 = arith.constant 66 : index
    %254 = memref.load %arg1[%c66] : memref<151xf32, #tpu.memory_space<smem>>
    %255 = vector.broadcast %254 : f32 to vector<1x256xf32>
    %256 = arith.mulf %255, %71 : vector<1x256xf32>
    %257 = arith.addf %253, %256 : vector<1x256xf32>
    %c67 = arith.constant 67 : index
    %258 = memref.load %arg1[%c67] : memref<151xf32, #tpu.memory_space<smem>>
    %259 = vector.broadcast %258 : f32 to vector<1x256xf32>
    %260 = arith.mulf %259, %81 : vector<1x256xf32>
    %261 = arith.addf %257, %260 : vector<1x256xf32>
    %c68 = arith.constant 68 : index
    %262 = memref.load %arg1[%c68] : memref<151xf32, #tpu.memory_space<smem>>
    %263 = vector.broadcast %262 : f32 to vector<1x256xf32>
    %264 = arith.mulf %263, %91 : vector<1x256xf32>
    %265 = arith.addf %261, %264 : vector<1x256xf32>
    %c69 = arith.constant 69 : index
    %266 = memref.load %arg1[%c69] : memref<151xf32, #tpu.memory_space<smem>>
    %267 = vector.broadcast %266 : f32 to vector<1x256xf32>
    %268 = arith.mulf %267, %101 : vector<1x256xf32>
    %269 = arith.addf %265, %268 : vector<1x256xf32>
    %c134 = arith.constant 134 : index
    %270 = memref.load %arg1[%c134] : memref<151xf32, #tpu.memory_space<smem>>
    %c70 = arith.constant 70 : index
    %271 = memref.load %arg1[%c70] : memref<151xf32, #tpu.memory_space<smem>>
    %272 = vector.broadcast %271 : f32 to vector<1x256xf32>
    %273 = arith.mulf %272, %11 : vector<1x256xf32>
    %274 = vector.broadcast %270 : f32 to vector<1x256xf32>
    %275 = arith.addf %274, %273 : vector<1x256xf32>
    %c71 = arith.constant 71 : index
    %276 = memref.load %arg1[%c71] : memref<151xf32, #tpu.memory_space<smem>>
    %277 = vector.broadcast %276 : f32 to vector<1x256xf32>
    %278 = arith.mulf %277, %21 : vector<1x256xf32>
    %279 = arith.addf %275, %278 : vector<1x256xf32>
    %c72 = arith.constant 72 : index
    %280 = memref.load %arg1[%c72] : memref<151xf32, #tpu.memory_space<smem>>
    %281 = vector.broadcast %280 : f32 to vector<1x256xf32>
    %282 = arith.mulf %281, %31 : vector<1x256xf32>
    %283 = arith.addf %279, %282 : vector<1x256xf32>
    %c73 = arith.constant 73 : index
    %284 = memref.load %arg1[%c73] : memref<151xf32, #tpu.memory_space<smem>>
    %285 = vector.broadcast %284 : f32 to vector<1x256xf32>
    %286 = arith.mulf %285, %41 : vector<1x256xf32>
    %287 = arith.addf %283, %286 : vector<1x256xf32>
    %c74 = arith.constant 74 : index
    %288 = memref.load %arg1[%c74] : memref<151xf32, #tpu.memory_space<smem>>
    %289 = vector.broadcast %288 : f32 to vector<1x256xf32>
    %290 = arith.mulf %289, %51 : vector<1x256xf32>
    %291 = arith.addf %287, %290 : vector<1x256xf32>
    %c75 = arith.constant 75 : index
    %292 = memref.load %arg1[%c75] : memref<151xf32, #tpu.memory_space<smem>>
    %293 = vector.broadcast %292 : f32 to vector<1x256xf32>
    %294 = arith.mulf %293, %61 : vector<1x256xf32>
    %295 = arith.addf %291, %294 : vector<1x256xf32>
    %c76 = arith.constant 76 : index
    %296 = memref.load %arg1[%c76] : memref<151xf32, #tpu.memory_space<smem>>
    %297 = vector.broadcast %296 : f32 to vector<1x256xf32>
    %298 = arith.mulf %297, %71 : vector<1x256xf32>
    %299 = arith.addf %295, %298 : vector<1x256xf32>
    %c77 = arith.constant 77 : index
    %300 = memref.load %arg1[%c77] : memref<151xf32, #tpu.memory_space<smem>>
    %301 = vector.broadcast %300 : f32 to vector<1x256xf32>
    %302 = arith.mulf %301, %81 : vector<1x256xf32>
    %303 = arith.addf %299, %302 : vector<1x256xf32>
    %c78 = arith.constant 78 : index
    %304 = memref.load %arg1[%c78] : memref<151xf32, #tpu.memory_space<smem>>
    %305 = vector.broadcast %304 : f32 to vector<1x256xf32>
    %306 = arith.mulf %305, %91 : vector<1x256xf32>
    %307 = arith.addf %303, %306 : vector<1x256xf32>
    %c79 = arith.constant 79 : index
    %308 = memref.load %arg1[%c79] : memref<151xf32, #tpu.memory_space<smem>>
    %309 = vector.broadcast %308 : f32 to vector<1x256xf32>
    %310 = arith.mulf %309, %101 : vector<1x256xf32>
    %311 = arith.addf %307, %310 : vector<1x256xf32>
    %c135 = arith.constant 135 : index
    %312 = memref.load %arg1[%c135] : memref<151xf32, #tpu.memory_space<smem>>
    %c80 = arith.constant 80 : index
    %313 = memref.load %arg1[%c80] : memref<151xf32, #tpu.memory_space<smem>>
    %314 = vector.broadcast %313 : f32 to vector<1x256xf32>
    %315 = arith.mulf %314, %11 : vector<1x256xf32>
    %316 = vector.broadcast %312 : f32 to vector<1x256xf32>
    %317 = arith.addf %316, %315 : vector<1x256xf32>
    %c81 = arith.constant 81 : index
    %318 = memref.load %arg1[%c81] : memref<151xf32, #tpu.memory_space<smem>>
    %319 = vector.broadcast %318 : f32 to vector<1x256xf32>
    %320 = arith.mulf %319, %21 : vector<1x256xf32>
    %321 = arith.addf %317, %320 : vector<1x256xf32>
    %c82 = arith.constant 82 : index
    %322 = memref.load %arg1[%c82] : memref<151xf32, #tpu.memory_space<smem>>
    %323 = vector.broadcast %322 : f32 to vector<1x256xf32>
    %324 = arith.mulf %323, %31 : vector<1x256xf32>
    %325 = arith.addf %321, %324 : vector<1x256xf32>
    %c83 = arith.constant 83 : index
    %326 = memref.load %arg1[%c83] : memref<151xf32, #tpu.memory_space<smem>>
    %327 = vector.broadcast %326 : f32 to vector<1x256xf32>
    %328 = arith.mulf %327, %41 : vector<1x256xf32>
    %329 = arith.addf %325, %328 : vector<1x256xf32>
    %c84 = arith.constant 84 : index
    %330 = memref.load %arg1[%c84] : memref<151xf32, #tpu.memory_space<smem>>
    %331 = vector.broadcast %330 : f32 to vector<1x256xf32>
    %332 = arith.mulf %331, %51 : vector<1x256xf32>
    %333 = arith.addf %329, %332 : vector<1x256xf32>
    %c85 = arith.constant 85 : index
    %334 = memref.load %arg1[%c85] : memref<151xf32, #tpu.memory_space<smem>>
    %335 = vector.broadcast %334 : f32 to vector<1x256xf32>
    %336 = arith.mulf %335, %61 : vector<1x256xf32>
    %337 = arith.addf %333, %336 : vector<1x256xf32>
    %c86 = arith.constant 86 : index
    %338 = memref.load %arg1[%c86] : memref<151xf32, #tpu.memory_space<smem>>
    %339 = vector.broadcast %338 : f32 to vector<1x256xf32>
    %340 = arith.mulf %339, %71 : vector<1x256xf32>
    %341 = arith.addf %337, %340 : vector<1x256xf32>
    %c87 = arith.constant 87 : index
    %342 = memref.load %arg1[%c87] : memref<151xf32, #tpu.memory_space<smem>>
    %343 = vector.broadcast %342 : f32 to vector<1x256xf32>
    %344 = arith.mulf %343, %81 : vector<1x256xf32>
    %345 = arith.addf %341, %344 : vector<1x256xf32>
    %c88 = arith.constant 88 : index
    %346 = memref.load %arg1[%c88] : memref<151xf32, #tpu.memory_space<smem>>
    %347 = vector.broadcast %346 : f32 to vector<1x256xf32>
    %348 = arith.mulf %347, %91 : vector<1x256xf32>
    %349 = arith.addf %345, %348 : vector<1x256xf32>
    %c89 = arith.constant 89 : index
    %350 = memref.load %arg1[%c89] : memref<151xf32, #tpu.memory_space<smem>>
    %351 = vector.broadcast %350 : f32 to vector<1x256xf32>
    %352 = arith.mulf %351, %101 : vector<1x256xf32>
    %353 = arith.addf %349, %352 : vector<1x256xf32>
    %c136 = arith.constant 136 : index
    %354 = memref.load %arg1[%c136] : memref<151xf32, #tpu.memory_space<smem>>
    %c90 = arith.constant 90 : index
    %355 = memref.load %arg1[%c90] : memref<151xf32, #tpu.memory_space<smem>>
    %356 = vector.broadcast %355 : f32 to vector<1x256xf32>
    %357 = arith.mulf %356, %11 : vector<1x256xf32>
    %358 = vector.broadcast %354 : f32 to vector<1x256xf32>
    %359 = arith.addf %358, %357 : vector<1x256xf32>
    %c91 = arith.constant 91 : index
    %360 = memref.load %arg1[%c91] : memref<151xf32, #tpu.memory_space<smem>>
    %361 = vector.broadcast %360 : f32 to vector<1x256xf32>
    %362 = arith.mulf %361, %21 : vector<1x256xf32>
    %363 = arith.addf %359, %362 : vector<1x256xf32>
    %c92 = arith.constant 92 : index
    %364 = memref.load %arg1[%c92] : memref<151xf32, #tpu.memory_space<smem>>
    %365 = vector.broadcast %364 : f32 to vector<1x256xf32>
    %366 = arith.mulf %365, %31 : vector<1x256xf32>
    %367 = arith.addf %363, %366 : vector<1x256xf32>
    %c93 = arith.constant 93 : index
    %368 = memref.load %arg1[%c93] : memref<151xf32, #tpu.memory_space<smem>>
    %369 = vector.broadcast %368 : f32 to vector<1x256xf32>
    %370 = arith.mulf %369, %41 : vector<1x256xf32>
    %371 = arith.addf %367, %370 : vector<1x256xf32>
    %c94 = arith.constant 94 : index
    %372 = memref.load %arg1[%c94] : memref<151xf32, #tpu.memory_space<smem>>
    %373 = vector.broadcast %372 : f32 to vector<1x256xf32>
    %374 = arith.mulf %373, %51 : vector<1x256xf32>
    %375 = arith.addf %371, %374 : vector<1x256xf32>
    %c95 = arith.constant 95 : index
    %376 = memref.load %arg1[%c95] : memref<151xf32, #tpu.memory_space<smem>>
    %377 = vector.broadcast %376 : f32 to vector<1x256xf32>
    %378 = arith.mulf %377, %61 : vector<1x256xf32>
    %379 = arith.addf %375, %378 : vector<1x256xf32>
    %c96 = arith.constant 96 : index
    %380 = memref.load %arg1[%c96] : memref<151xf32, #tpu.memory_space<smem>>
    %381 = vector.broadcast %380 : f32 to vector<1x256xf32>
    %382 = arith.mulf %381, %71 : vector<1x256xf32>
    %383 = arith.addf %379, %382 : vector<1x256xf32>
    %c97 = arith.constant 97 : index
    %384 = memref.load %arg1[%c97] : memref<151xf32, #tpu.memory_space<smem>>
    %385 = vector.broadcast %384 : f32 to vector<1x256xf32>
    %386 = arith.mulf %385, %81 : vector<1x256xf32>
    %387 = arith.addf %383, %386 : vector<1x256xf32>
    %c98 = arith.constant 98 : index
    %388 = memref.load %arg1[%c98] : memref<151xf32, #tpu.memory_space<smem>>
    %389 = vector.broadcast %388 : f32 to vector<1x256xf32>
    %390 = arith.mulf %389, %91 : vector<1x256xf32>
    %391 = arith.addf %387, %390 : vector<1x256xf32>
    %c99 = arith.constant 99 : index
    %392 = memref.load %arg1[%c99] : memref<151xf32, #tpu.memory_space<smem>>
    %393 = vector.broadcast %392 : f32 to vector<1x256xf32>
    %394 = arith.mulf %393, %101 : vector<1x256xf32>
    %395 = arith.addf %391, %394 : vector<1x256xf32>
    %c137 = arith.constant 137 : index
    %396 = memref.load %arg1[%c137] : memref<151xf32, #tpu.memory_space<smem>>
    %c100 = arith.constant 100 : index
    %397 = memref.load %arg1[%c100] : memref<151xf32, #tpu.memory_space<smem>>
    %398 = vector.broadcast %397 : f32 to vector<1x256xf32>
    %399 = arith.mulf %398, %11 : vector<1x256xf32>
    %400 = vector.broadcast %396 : f32 to vector<1x256xf32>
    %401 = arith.addf %400, %399 : vector<1x256xf32>
    %c101 = arith.constant 101 : index
    %402 = memref.load %arg1[%c101] : memref<151xf32, #tpu.memory_space<smem>>
    %403 = vector.broadcast %402 : f32 to vector<1x256xf32>
    %404 = arith.mulf %403, %21 : vector<1x256xf32>
    %405 = arith.addf %401, %404 : vector<1x256xf32>
    %c102 = arith.constant 102 : index
    %406 = memref.load %arg1[%c102] : memref<151xf32, #tpu.memory_space<smem>>
    %407 = vector.broadcast %406 : f32 to vector<1x256xf32>
    %408 = arith.mulf %407, %31 : vector<1x256xf32>
    %409 = arith.addf %405, %408 : vector<1x256xf32>
    %c103 = arith.constant 103 : index
    %410 = memref.load %arg1[%c103] : memref<151xf32, #tpu.memory_space<smem>>
    %411 = vector.broadcast %410 : f32 to vector<1x256xf32>
    %412 = arith.mulf %411, %41 : vector<1x256xf32>
    %413 = arith.addf %409, %412 : vector<1x256xf32>
    %c104 = arith.constant 104 : index
    %414 = memref.load %arg1[%c104] : memref<151xf32, #tpu.memory_space<smem>>
    %415 = vector.broadcast %414 : f32 to vector<1x256xf32>
    %416 = arith.mulf %415, %51 : vector<1x256xf32>
    %417 = arith.addf %413, %416 : vector<1x256xf32>
    %c105 = arith.constant 105 : index
    %418 = memref.load %arg1[%c105] : memref<151xf32, #tpu.memory_space<smem>>
    %419 = vector.broadcast %418 : f32 to vector<1x256xf32>
    %420 = arith.mulf %419, %61 : vector<1x256xf32>
    %421 = arith.addf %417, %420 : vector<1x256xf32>
    %c106 = arith.constant 106 : index
    %422 = memref.load %arg1[%c106] : memref<151xf32, #tpu.memory_space<smem>>
    %423 = vector.broadcast %422 : f32 to vector<1x256xf32>
    %424 = arith.mulf %423, %71 : vector<1x256xf32>
    %425 = arith.addf %421, %424 : vector<1x256xf32>
    %c107 = arith.constant 107 : index
    %426 = memref.load %arg1[%c107] : memref<151xf32, #tpu.memory_space<smem>>
    %427 = vector.broadcast %426 : f32 to vector<1x256xf32>
    %428 = arith.mulf %427, %81 : vector<1x256xf32>
    %429 = arith.addf %425, %428 : vector<1x256xf32>
    %c108 = arith.constant 108 : index
    %430 = memref.load %arg1[%c108] : memref<151xf32, #tpu.memory_space<smem>>
    %431 = vector.broadcast %430 : f32 to vector<1x256xf32>
    %432 = arith.mulf %431, %91 : vector<1x256xf32>
    %433 = arith.addf %429, %432 : vector<1x256xf32>
    %c109 = arith.constant 109 : index
    %434 = memref.load %arg1[%c109] : memref<151xf32, #tpu.memory_space<smem>>
    %435 = vector.broadcast %434 : f32 to vector<1x256xf32>
    %436 = arith.mulf %435, %101 : vector<1x256xf32>
    %437 = arith.addf %433, %436 : vector<1x256xf32>
    %c138 = arith.constant 138 : index
    %438 = memref.load %arg1[%c138] : memref<151xf32, #tpu.memory_space<smem>>
    %c110 = arith.constant 110 : index
    %439 = memref.load %arg1[%c110] : memref<151xf32, #tpu.memory_space<smem>>
    %440 = vector.broadcast %439 : f32 to vector<1x256xf32>
    %441 = arith.mulf %440, %11 : vector<1x256xf32>
    %442 = vector.broadcast %438 : f32 to vector<1x256xf32>
    %443 = arith.addf %442, %441 : vector<1x256xf32>
    %c111 = arith.constant 111 : index
    %444 = memref.load %arg1[%c111] : memref<151xf32, #tpu.memory_space<smem>>
    %445 = vector.broadcast %444 : f32 to vector<1x256xf32>
    %446 = arith.mulf %445, %21 : vector<1x256xf32>
    %447 = arith.addf %443, %446 : vector<1x256xf32>
    %c112 = arith.constant 112 : index
    %448 = memref.load %arg1[%c112] : memref<151xf32, #tpu.memory_space<smem>>
    %449 = vector.broadcast %448 : f32 to vector<1x256xf32>
    %450 = arith.mulf %449, %31 : vector<1x256xf32>
    %451 = arith.addf %447, %450 : vector<1x256xf32>
    %c113 = arith.constant 113 : index
    %452 = memref.load %arg1[%c113] : memref<151xf32, #tpu.memory_space<smem>>
    %453 = vector.broadcast %452 : f32 to vector<1x256xf32>
    %454 = arith.mulf %453, %41 : vector<1x256xf32>
    %455 = arith.addf %451, %454 : vector<1x256xf32>
    %c114 = arith.constant 114 : index
    %456 = memref.load %arg1[%c114] : memref<151xf32, #tpu.memory_space<smem>>
    %457 = vector.broadcast %456 : f32 to vector<1x256xf32>
    %458 = arith.mulf %457, %51 : vector<1x256xf32>
    %459 = arith.addf %455, %458 : vector<1x256xf32>
    %c115 = arith.constant 115 : index
    %460 = memref.load %arg1[%c115] : memref<151xf32, #tpu.memory_space<smem>>
    %461 = vector.broadcast %460 : f32 to vector<1x256xf32>
    %462 = arith.mulf %461, %61 : vector<1x256xf32>
    %463 = arith.addf %459, %462 : vector<1x256xf32>
    %c116 = arith.constant 116 : index
    %464 = memref.load %arg1[%c116] : memref<151xf32, #tpu.memory_space<smem>>
    %465 = vector.broadcast %464 : f32 to vector<1x256xf32>
    %466 = arith.mulf %465, %71 : vector<1x256xf32>
    %467 = arith.addf %463, %466 : vector<1x256xf32>
    %c117 = arith.constant 117 : index
    %468 = memref.load %arg1[%c117] : memref<151xf32, #tpu.memory_space<smem>>
    %469 = vector.broadcast %468 : f32 to vector<1x256xf32>
    %470 = arith.mulf %469, %81 : vector<1x256xf32>
    %471 = arith.addf %467, %470 : vector<1x256xf32>
    %c118 = arith.constant 118 : index
    %472 = memref.load %arg1[%c118] : memref<151xf32, #tpu.memory_space<smem>>
    %473 = vector.broadcast %472 : f32 to vector<1x256xf32>
    %474 = arith.mulf %473, %91 : vector<1x256xf32>
    %475 = arith.addf %471, %474 : vector<1x256xf32>
    %c119 = arith.constant 119 : index
    %476 = memref.load %arg1[%c119] : memref<151xf32, #tpu.memory_space<smem>>
    %477 = vector.broadcast %476 : f32 to vector<1x256xf32>
    %478 = arith.mulf %477, %101 : vector<1x256xf32>
    %479 = arith.addf %475, %478 : vector<1x256xf32>
    %c139 = arith.constant 139 : index
    %480 = memref.load %arg1[%c139] : memref<151xf32, #tpu.memory_space<smem>>
    %c120 = arith.constant 120 : index
    %481 = memref.load %arg1[%c120] : memref<151xf32, #tpu.memory_space<smem>>
    %482 = vector.broadcast %481 : f32 to vector<1x256xf32>
    %483 = arith.mulf %482, %11 : vector<1x256xf32>
    %484 = vector.broadcast %480 : f32 to vector<1x256xf32>
    %485 = arith.addf %484, %483 : vector<1x256xf32>
    %c121 = arith.constant 121 : index
    %486 = memref.load %arg1[%c121] : memref<151xf32, #tpu.memory_space<smem>>
    %487 = vector.broadcast %486 : f32 to vector<1x256xf32>
    %488 = arith.mulf %487, %21 : vector<1x256xf32>
    %489 = arith.addf %485, %488 : vector<1x256xf32>
    %c122 = arith.constant 122 : index
    %490 = memref.load %arg1[%c122] : memref<151xf32, #tpu.memory_space<smem>>
    %491 = vector.broadcast %490 : f32 to vector<1x256xf32>
    %492 = arith.mulf %491, %31 : vector<1x256xf32>
    %493 = arith.addf %489, %492 : vector<1x256xf32>
    %c123 = arith.constant 123 : index
    %494 = memref.load %arg1[%c123] : memref<151xf32, #tpu.memory_space<smem>>
    %495 = vector.broadcast %494 : f32 to vector<1x256xf32>
    %496 = arith.mulf %495, %41 : vector<1x256xf32>
    %497 = arith.addf %493, %496 : vector<1x256xf32>
    %c124 = arith.constant 124 : index
    %498 = memref.load %arg1[%c124] : memref<151xf32, #tpu.memory_space<smem>>
    %499 = vector.broadcast %498 : f32 to vector<1x256xf32>
    %500 = arith.mulf %499, %51 : vector<1x256xf32>
    %501 = arith.addf %497, %500 : vector<1x256xf32>
    %c125 = arith.constant 125 : index
    %502 = memref.load %arg1[%c125] : memref<151xf32, #tpu.memory_space<smem>>
    %503 = vector.broadcast %502 : f32 to vector<1x256xf32>
    %504 = arith.mulf %503, %61 : vector<1x256xf32>
    %505 = arith.addf %501, %504 : vector<1x256xf32>
    %c126 = arith.constant 126 : index
    %506 = memref.load %arg1[%c126] : memref<151xf32, #tpu.memory_space<smem>>
    %507 = vector.broadcast %506 : f32 to vector<1x256xf32>
    %508 = arith.mulf %507, %71 : vector<1x256xf32>
    %509 = arith.addf %505, %508 : vector<1x256xf32>
    %c127 = arith.constant 127 : index
    %510 = memref.load %arg1[%c127] : memref<151xf32, #tpu.memory_space<smem>>
    %511 = vector.broadcast %510 : f32 to vector<1x256xf32>
    %512 = arith.mulf %511, %81 : vector<1x256xf32>
    %513 = arith.addf %509, %512 : vector<1x256xf32>
    %c128 = arith.constant 128 : index
    %514 = memref.load %arg1[%c128] : memref<151xf32, #tpu.memory_space<smem>>
    %515 = vector.broadcast %514 : f32 to vector<1x256xf32>
    %516 = arith.mulf %515, %91 : vector<1x256xf32>
    %517 = arith.addf %513, %516 : vector<1x256xf32>
    %c129 = arith.constant 129 : index
    %518 = memref.load %arg1[%c129] : memref<151xf32, #tpu.memory_space<smem>>
    %519 = vector.broadcast %518 : f32 to vector<1x256xf32>
    %520 = arith.mulf %519, %101 : vector<1x256xf32>
    %521 = arith.addf %517, %520 : vector<1x256xf32>
    %c150 = arith.constant 150 : index
    %522 = memref.load %arg1[%c150] : memref<151xf32, #tpu.memory_space<smem>>
    %c140 = arith.constant 140 : index
    %523 = memref.load %arg1[%c140] : memref<151xf32, #tpu.memory_space<smem>>
    %524 = vector.broadcast %523 : f32 to vector<1x256xf32>
    %525 = arith.mulf %524, %143 : vector<1x256xf32>
    %526 = vector.broadcast %522 : f32 to vector<1x256xf32>
    %527 = arith.addf %526, %525 : vector<1x256xf32>
    %c141 = arith.constant 141 : index
    %528 = memref.load %arg1[%c141] : memref<151xf32, #tpu.memory_space<smem>>
    %529 = vector.broadcast %528 : f32 to vector<1x256xf32>
    %530 = arith.mulf %529, %185 : vector<1x256xf32>
    %531 = arith.addf %527, %530 : vector<1x256xf32>
    %c142 = arith.constant 142 : index
    %532 = memref.load %arg1[%c142] : memref<151xf32, #tpu.memory_space<smem>>
    %533 = vector.broadcast %532 : f32 to vector<1x256xf32>
    %534 = arith.mulf %533, %227 : vector<1x256xf32>
    %535 = arith.addf %531, %534 : vector<1x256xf32>
    %c143 = arith.constant 143 : index
    %536 = memref.load %arg1[%c143] : memref<151xf32, #tpu.memory_space<smem>>
    %537 = vector.broadcast %536 : f32 to vector<1x256xf32>
    %538 = arith.mulf %537, %269 : vector<1x256xf32>
    %539 = arith.addf %535, %538 : vector<1x256xf32>
    %c144 = arith.constant 144 : index
    %540 = memref.load %arg1[%c144] : memref<151xf32, #tpu.memory_space<smem>>
    %541 = vector.broadcast %540 : f32 to vector<1x256xf32>
    %542 = arith.mulf %541, %311 : vector<1x256xf32>
    %543 = arith.addf %539, %542 : vector<1x256xf32>
    %c145 = arith.constant 145 : index
    %544 = memref.load %arg1[%c145] : memref<151xf32, #tpu.memory_space<smem>>
    %545 = vector.broadcast %544 : f32 to vector<1x256xf32>
    %546 = arith.mulf %545, %353 : vector<1x256xf32>
    %547 = arith.addf %543, %546 : vector<1x256xf32>
    %c146 = arith.constant 146 : index
    %548 = memref.load %arg1[%c146] : memref<151xf32, #tpu.memory_space<smem>>
    %549 = vector.broadcast %548 : f32 to vector<1x256xf32>
    %550 = arith.mulf %549, %395 : vector<1x256xf32>
    %551 = arith.addf %547, %550 : vector<1x256xf32>
    %c147 = arith.constant 147 : index
    %552 = memref.load %arg1[%c147] : memref<151xf32, #tpu.memory_space<smem>>
    %553 = vector.broadcast %552 : f32 to vector<1x256xf32>
    %554 = arith.mulf %553, %437 : vector<1x256xf32>
    %555 = arith.addf %551, %554 : vector<1x256xf32>
    %c148 = arith.constant 148 : index
    %556 = memref.load %arg1[%c148] : memref<151xf32, #tpu.memory_space<smem>>
    %557 = vector.broadcast %556 : f32 to vector<1x256xf32>
    %558 = arith.mulf %557, %479 : vector<1x256xf32>
    %559 = arith.addf %555, %558 : vector<1x256xf32>
    %c149 = arith.constant 149 : index
    %560 = memref.load %arg1[%c149] : memref<151xf32, #tpu.memory_space<smem>>
    %561 = vector.broadcast %560 : f32 to vector<1x256xf32>
    %562 = arith.mulf %561, %521 : vector<1x256xf32>
    %563 = arith.addf %559, %562 : vector<1x256xf32>
    %c0_4 = arith.constant 0 : index
    %c0_5 = arith.constant 0 : index
    %564 = vector.load %arg3[%c0_4, %c0_5] : memref<1x256xf32, #tpu.memory_space<vmem>>, vector<1x256xf32>
    tpu.vector_store %arg3[%c0_4, %c0_5], %563 {strides = array<i32>} : memref<1x256xf32, #tpu.memory_space<vmem>>, vector<1x256xf32>,
    return
  }
  func.func @transform_0(%arg0: i32) -> i32 {
    %c0_i32 = arith.constant 0 : i32
    %c0_i32_0 = arith.constant 0 : i32
    return %c0_i32 : i32
  }
  func.func @transform_1(%arg0: i32) -> (i32, i32) {
    %c0_i32 = arith.constant 0 : i32
    %c0_i32_0 = arith.constant 0 : i32
    return %c0_i32, %arg0 : i32, i32
  }
  func.func @transform_2(%arg0: i32) -> (i32, i32) {
    %c0_i32 = arith.constant 0 : i32
    %c0_i32_0 = arith.constant 0 : i32
    return %c0_i32, %arg0 : i32, i32
  }
}

</mosaic_0001>

<bundles_post_ra>
// kernel: circle_model_v2.1
= control target key start
LH: loop header
LB: loop body
LE: loop exit
PB: predicated region body
PF: predicated region fallthrough
CT: control target
= control target key end

     0   :  { %s1838_s0 = inlined_call_operand.vmem [shape: f32[151], index: 0, kind: input, shape index: {}]   ;;  %s1839_s1 = inlined_call_operand.vmem [shape: f32[2,512], index: 1, kind: input, shape index: {}]   ;;  %s1840_s2 = inlined_call_operand.hbm [shape: f32[1,512], index: 2, kind: output, shape index: {}]  }
   0x1   :  { %1853 = sst [smem:[#allocation43_spill]] %s1838_s0 }
   0x2   :  { %1854 = sst [smem:[#allocation44_spill]] %s1839_s1 }
   0x3   :  { %1855 = sst [smem:[#allocation45_spill]] %s1840_s2 }
   0x4   :  { %7 = vsyncpa [#allocation4], 0 }
   0x5   :  { %8 = vsyncpa [#allocation3], 0 }
   0x6   :  { %10 = vsyncpa [#allocation3 + $0x1], 0  ;;  %s1129_s9 = smov 0   ;;  %s1131_s10 = smov 0  }
   0x7   :  { %s1133_s11 = smov 0   ;;  %s1135_s12 = smov 0  }
   0x8 LB: > { %1856 = sst [smem:[#allocation8_spill]] %s1099_s9  ;;  %s815_s13 = sadd.s32 4294967295, %s1111_s12   ;;  %s1111_s12 = sphi %s1135_s12, %s1938_s12   ;;  %s1107_s11 = sphi %s1133_s11, %s1941_s11   ;;  %s1103_s10 = sphi %s1131_s10, %s1940_s10   ;;  %s1099_s9 = sphi %s1129_s9, %s1939_s9  }
   0x9   : > { %1857 = sst [smem:[#allocation9_spill]] %s1103_s10  ;;  %s816_s14 = sadd.s32 4294967294, %s1111_s12  }
   0xa   : > { %1858 = sst [smem:[#allocation10_spill]] %s1107_s11  ;;  %s1152_s15 = sadd.s32 1, %s1111_s12  }
   0xb   : > { %1859 = sst [smem:[#allocation11_spill]] %s1111_s12  ;;  %s70_s16 = sadd.s32 1, %s1107_s11 }
   0xc   : > { %1860 = sst [smem:[#allocation12_spill]] %s1152_s15  ;;  %s67_s17 = ssub.s32 %s1111_s12, %s1152_s15 }
   0xd   : > { %p80_p0 = scmp.ne.s32.totalorder %s1107_s11, %s1103_s10  ;;  %p68_p1 = scmp.eq.s32.totalorder %s67_s17, 0 }
   0xe   : > { %p81_p2 = scmp.eq.s32.totalorder %s815_s13, 1  ;;  %p86_p3 = scmp.ne.s32.totalorder %s1103_s10, %s1099_s9 }
   0xf   : > { %p87_p4 = scmp.eq.s32.totalorder %s816_s14, 1  ;;  %p817_p7 = scmp.ge.s32.totalorder %s1111_s12, 1 }
  0x10   : > { %s1162_s18 = scalar_select %p68_p1, %s1107_s11, %s70_s16  }
  0x11   : > { %p1164_p5 = por %p81_p2, %p80_p0  ;;  %p1168_p6 = por %p87_p4, %p86_p3 }
  0x12   : > { %1861 = sst [smem:[#allocation13_spill]] %s1162_s18  ;;  %p94_p8 = scmp.lt.s32.totalorder %s1111_s12, 3 }
  0x13   : > { %s1862_s19 = scalar_select %p1164_p5, 1, 0 }
  0x14   : > { %s1864_s20 = scalar_select %p1168_p6, 1, 0 }
  0x15   : > { %1863 = sst [smem:[#allocation14_spill]] %s1862_s19  ;;  %p994_p9 = scmp.eq.s32.totalorder %s815_s13, 0 }
  0x16   : > { %1865 = sst [smem:[#allocation15_spill]] %s1864_s20  ;;  %p95_p10 = pnand %p817_p7, %p94_p8 }
  0x17   : > { %s1866_s0 = sld [smem:[#allocation43_spill]]  ;;  %s1113_s24 = smov [#allocation2]  }
  0x18   : > { %p986_p11 = pneg %p95_p10 }
  0x1a   : > { %p987_p12 = pnand %p994_p9, %p986_p11  ;;  %128 = sbr.rel (%p95_p10) target bundleno = 272 (0x110), region = 28 }
  0x1d   : > { %s106_s23 = sshll.u32 %s1866_s0, 4  ;;  %s107_s23 = int_to_ptr.vmem [resolvable:$true] %s106_s23 }
  0x1e   : > { %989 = dma.vmem_to_smem (!%p987_p12), %s107_s23, 32, %s1113_s24, [#allocation4]  }
  0x1f   : > { %1090 = dma.done.wait (%p994_p9), [#allocation4], 32  }
  0x20   : > { %1092 = vsyncadd (%p994_p9), [#allocation4], 4294967264 }
  0x21   : > { %135 = sfence }
  0x22   : > { %s1177_s25 = sshll.u32 %s815_s13, 1  ;;  %s1180_s26 = sld [smem:[#allocation2 + $0x14]] }
  0x23   : > { %1867 = sst [smem:[#allocation16_spill]] %s1177_s25  ;;  %p153_p13 = scmp.lt.s32.totalorder %s1177_s25, 3 }
  0x24   : > { %s1185_s28 = sld [smem:[#allocation2]] }
  0x25   : > { %s1183_s27 = scalar_select %p153_p13, %s1177_s25, 3 }
  0x26   : > { %s1187_s29 = sld [smem:[#allocation2 + $0x1]] }
  0x27   : > { %s1189_s30 = sld [smem:[#allocation2 + $0x15]] }
  0x28   : > { %s1191_s3 = sld [smem:[#allocation2 + $0x2]]  ;;  %v166_v4 = vstv %s1180_s26 }
  0x29   : > { %s1193_s4 = sld [smem:[#allocation2 + $0x3]] }
  0x2a   : > { %s1195_s5 = sld [smem:[#allocation2 + $0x16]]  ;;  %v164_v1 = vstv %s1185_s28 }
  0x2b   : > { %s1197_s6 = sld [smem:[#allocation2 + $0x4]] }
  0x2c   : > { %s1199_s7 = sld [smem:[#allocation2 + $0x5]]  ;;  %v169_v5 = vstv %s1187_s29 }
  0x2d   : > { %s1201_s8 = sld [smem:[#allocation2 + $0x17]]  ;;  %v176_v11 = vstv %s1189_s30 }
  0x2e   : > { %s1203_s13 = sld [smem:[#allocation2 + $0x6]]  ;;  %v174_v6 = vstv %s1191_s3 }
  0x2f   : > { %s1205_s14 = sld [smem:[#allocation2 + $0x7]]  ;;  %v179_v12 = vstv %s1193_s4 }
  0x30   : > { %s1207_s16 = sld [smem:[#allocation2 + $0x18]]  ;;  %v186_v14 = vstv %s1195_s5 }
  0x31   : > { %s1209_s17 = sld [smem:[#allocation2 + $0x8]]  ;;  %v184_v7 = vstv %s1197_s6 }
  0x32   : > { %s1211_s21 = sld [smem:[#allocation2 + $0x9]]  ;;  %v189_v15 = vstv %s1199_s7 }
  0x33   : > { %s1213_s22 = sld [smem:[#allocation2 + $0x19]]  ;;  %v196_v26 = vstv %s1201_s8 }
  0x34   : > { %s1215_s23 = sld [smem:[#allocation2 + $0xa]]  ;;  %v194_v19 = vstv %s1203_s13 }
  0x35   : > { %s1217_s24 = sld [smem:[#allocation2 + $0xb]]  ;;  %v199_v27 = vstv %s1205_s14 }
  0x36   : > { %s1219_s0 = sld [smem:[#allocation2 + $0x1a]]  ;;  %v206_v35 = vstv %s1207_s16 }
  0x37   : > { %s1221_s18 = sld [smem:[#allocation2 + $0xc]]  ;;  %v204_v24 = vstv %s1209_s17 }
  0x38   : > { %s1223_s11 = sld [smem:[#allocation2 + $0xd]]  ;;  %v209_v36 = vstv %s1211_s21 }
  0x39   : > { %1868 = sst [smem:[#allocation17_spill]] %s1213_s22  ;;  %s824_s22 = sshll.u32 %s1183_s27, 1 }
  0x3a   : > { %1869 = sst [smem:[#allocation18_spill]] %s1215_s23 }
  0x3b   : > { %1870 = sst [smem:[#allocation19_spill]] %s1217_s24 }
  0x3c   : > { %1871 = sst [smem:[#allocation20_spill]] %s1219_s0 }
  0x3d   : > { %1872 = sst [smem:[#allocation21_spill]] %s1221_s18 }
  0x3e   : > { %1873 = sst [smem:[#allocation22_spill]] %s1223_s11 }
  0x3f   : > { %s1225_s15 = sld [smem:[#allocation2 + $0x1b]] }
  0x40   : > { %s1227_s20 = sld [smem:[#allocation2 + $0xe]] }
  0x41   : > { %s1229_s9 = sld [smem:[#allocation2 + $0xf]] }
  0x42   : > { %s1231_s12 = sld [smem:[#allocation2 + $0x1c]] }
  0x43   : > { %s1233_s19 = sld [smem:[#allocation2 + $0x10]] }
  0x44   : > { %s1235_s2 = sld [smem:[#allocation2 + $0x11]] }
  0x45   : > { %1874 = sst [smem:[#allocation23_spill]] %s1225_s15 }
  0x46   : > { %1875 = sst [smem:[#allocation24_spill]] %s1227_s20 }
  0x47   : > { %1876 = sst [smem:[#allocation25_spill]] %s1229_s9 }
  0x48   : > { %1877 = sst [smem:[#allocation26_spill]] %s1231_s12 }
  0x49   : > { %1878 = sst [smem:[#allocation27_spill]] %s1233_s19 }
  0x4a   : > { %1879 = sst [smem:[#allocation28_spill]] %s1235_s2 }
  0x4b   : > { %s1237_s25 = sld [smem:[#allocation2 + $0x1d]] }
  0x4c   : > { %s1239_s10 = sld [smem:[#allocation2 + $0x12]] }
  0x4d   : > { %s1241_s0 = sld [smem:[#allocation2 + $0x13]] }
  0x4e   : > { %s1243_s11 = sld [smem:[#allocation2 + $0x82]] }
  0x4f   : > { %s1245_s15 = sld [smem:[#allocation2 + $0x1e]] }
  0x50   : > { %s1247_s20 = sld [smem:[#allocation2 + $0x1f]] }
  0x51   : > { %1880 = sst [smem:[#allocation29_spill]] %s1237_s25 }
  0x52   : > { %1881 = sst [smem:[#allocation30_spill]] %s1239_s10 }
  0x53   : > { %1882 = sst [smem:[#allocation31_spill]] %s1241_s0 }
  0x54   : > { %s1249_s9 = sld [smem:[#allocation2 + $0x20]]  ;;  %v266_v29 = vstv %s1243_s11 }
  0x55   : > { %s1251_s12 = sld [smem:[#allocation2 + $0x21]]  ;;  %v264_v20 = vstv %s1245_s15 }
  0x56   : > { %s1253_s19 = sld [smem:[#allocation2 + $0x22]]  ;;  %v269_v30 = vstv %s1247_s20 }
  0x57   : > { %s1255_s2 = sld [smem:[#allocation2 + $0x23]] }
  0x58   : > { %s1257_s25 = sld [smem:[#allocation2 + $0x24]] }
  0x59   : > { %s1259_s10 = sld [smem:[#allocation2 + $0x25]] }
  0x5a   : > { %1883 = sst [smem:[#allocation32_spill]] %s1249_s9 }
  0x5b   : > { %1884 = sst [smem:[#allocation33_spill]] %s1251_s12 }
  0x5c   : > { %1885 = sst [smem:[#allocation34_spill]] %s1253_s19 }
  0x5d   : > { %1886 = sst [smem:[#allocation35_spill]] %s1255_s2 }
  0x5e   : > { %1887 = sst [smem:[#allocation36_spill]] %s1257_s25 }
  0x5f   : > { %1888 = sst [smem:[#allocation37_spill]] %s1259_s10 }
  0x60   : > { %s1261_s0 = sld [smem:[#allocation2 + $0x26]] }
  0x61   : > { %s1264_s24 = sld [smem:[#allocation2 + $0x27]] }
  0x62   : > { %s1266_s18 = sld [smem:[#allocation2 + $0x83]] }
  0x63   : > { %s1268_s9 = sld [smem:[#allocation2 + $0x28]] }
  0x64   : > { %s1891_s1 = sld [smem:[#allocation44_spill]] }
  0x65   : > { %s1273_s23 = sld [smem:[#allocation2 + $0x29]] }
  0x66   : > { %1889 = sst [smem:[#allocation38_spill]] %s1261_s0 }
  0x67   : > { %1890 = sst [smem:[#allocation39_spill]] %s1264_s24 }
  0x68   : > { %s1275_s10 = sld [smem:[#allocation2 + $0x2a]]  ;;  %v308_v51 = vstv %s1266_s18 }
  0x69   : > { %s1277_s0 = sld [smem:[#allocation2 + $0x2b]]  ;;  %v306_v40 = vstv %s1268_s9 }
  0x6a   : > { %s156_s2 = scalar_lea.vmem %s1891_s1, %s824_s22  ;;  %s1282_s27 = sld [smem:[#allocation2 + $0x2c]] }
  0x6b   : > { %v1279_v0 = vld [vmem:[%s156_s2] ss:$2 sm:$0x3]  ;;  %s1284_s24 = sld [smem:[#allocation2 + $0x2d]]  ;;  %v311_v52 = vstv %s1273_s23 }
  0x6c   : > { %s1286_s25 = sld [smem:[#allocation2 + $0x2e]]  ;;  %v165_v2 = vmul.f32 %v164_v1, %v1279_v0  ;;  %v1291_v3 = vld [vmem:[%s156_s2 + $0x1] ss:$2 sm:$0x3]  ;;  %v175_v10 = vmul.f32 %v174_v6, %v1279_v0  ;;  %v185_v13 = vmul.f32 %v184_v7, %v1279_v0  ;;  %v195_v23 = vmul.f32 %v194_v19, %v1279_v0 }
  0x6d   : > { %s1289_s12 = sld [smem:[#allocation2 + $0x2f]]  ;;  %v170_v9 = vmul.f32 %v1291_v3, %v169_v5  ;;  %v180_v18 = vmul.f32 %v1291_v3, %v179_v12  ;;  %v190_v22 = vmul.f32 %v1291_v3, %v189_v15  ;;  %v205_v32 = vmul.f32 %v204_v24, %v1279_v0 }
  0x6e   : > { %s1296_s19 = sld [smem:[#allocation2 + $0x30]]  ;;  %v167_v8 = vadd.f32 %v166_v4, %v165_v2  ;;  %v177_v17 = vadd.f32 %v176_v11, %v175_v10  ;;  %v187_v21 = vadd.f32 %v186_v14, %v185_v13  ;;  %v197_v33 = vadd.f32 %v196_v26, %v195_v23 }
  0x6f   : > { %s1298_s28 = sld [smem:[#allocation2 + $0x31]]  ;;  %v200_v34 = vmul.f32 %v1291_v3, %v199_v27  ;;  %v207_v42 = vadd.f32 %v206_v35, %v205_v32  ;;  %v210_v43 = vmul.f32 %v1291_v3, %v209_v36  ;;  %v315_v5 = vstv %s1275_s10 }
  0x70   : > { %s1301_s22 = sld [smem:[#allocation2 + $0x84]]  ;;  %v1318_v16 = vadd.f32 %v170_v9, %v167_v8  ;;  %v1334_v25 = vadd.f32 %v180_v18, %v177_v17  ;;  %v1345_v31 = vadd.f32 %v190_v22, %v187_v21  ;;  %v319_v22 = vstv %s1277_s0 }
  0x71   : > { %s1305_s2 = sld [smem:[#allocation2 + $0x32]]  ;;  %v1367_v45 = vadd.f32 %v200_v34, %v197_v33  ;;  %v1384_v56 = vadd.f32 %v210_v43, %v207_v42 }
  0x72   : > { %s1309_s26 = sld [smem:[#allocation2 + $0x33]]  ;;  %v265_v28 = vmul.f32 %v264_v20, %v1318_v16  ;;  %v270_v39 = vmul.f32 %v269_v30, %v1334_v25  ;;  %v307_v48 = vmul.f32 %v306_v40, %v1318_v16  ;;  %v312_v63 = vmul.f32 %v311_v52, %v1334_v25 }
  0x73   : > { %s1312_s29 = sld [smem:[#allocation2 + $0x34]]  ;;  %v316_v17 = vmul.f32 %v315_v5, %v1345_v31  ;;  %v320_v34 = vmul.f32 %v319_v22, %v1367_v45  ;;  %v323_v40 = vstv %s1282_s27 }
  0x74   : > { %s1316_s3 = sld [smem:[#allocation2 + $0x35]]  ;;  %v267_v38 = vadd.f32 %v266_v29, %v265_v28  ;;  %v309_v62 = vadd.f32 %v308_v51, %v307_v48 }
  0x75   : > { %1892 = sst [smem:[#allocation40_spill]] %s1298_s28 }
  0x76   : > { %s1322_s30 = sld [smem:[#allocation2 + $0x36]]  ;;  %v271_v49 = vadd.f32 %v270_v39, %v267_v38  ;;  %v313_v15 = vadd.f32 %v312_v63, %v309_v62  ;;  %v350_v35 = vstv %s1301_s22 }
  0x77   : > { %s1325_s4 = sld [smem:[#allocation2 + $0x37]]  ;;  %v348_v18 = vstv %s1305_s2 }
  0x78   : > { %s1328_s5 = sld [smem:[#allocation2 + $0x38]]  ;;  %v349_v32 = vmul.f32 %v348_v18, %v1318_v16  ;;  %v317_v33 = vadd.f32 %v316_v17, %v313_v15  ;;  %v353_v36 = vstv %s1309_s26 }
  0x79   : > { %s1332_s6 = sld [smem:[#allocation2 + $0x39]]  ;;  %v357_v52 = vstv %s1312_s29 }
  0x7a   : > { %s1895_s7 = sld [smem:[#allocation18_spill]]  ;;  %v351_v48 = vadd.f32 %v350_v35, %v349_v32  ;;  %v321_v51 = vadd.f32 %v320_v34, %v317_v33  ;;  %v339_v32 = vstv %s1296_s19 }
  0x7b   : > { %s1339_s15 = sld [smem:[#allocation2 + $0x3a]] }
  0x7c   : > { %s1897_s13 = sld [smem:[#allocation32_spill]] }
  0x7d   : > { %s1343_s1 = sld [smem:[#allocation2 + $0x3b]] }
  0x7e   : > { %1893 = sst [smem:[#allocation41_spill]] %s1328_s5 }
  0x7f   : > { %1894 = sst [smem:[#allocation42_spill]] %s1332_s6 }
  0x80   : > { %s1899_s17 = sld [smem:[#allocation21_spill]]  ;;  %v214_v37 = vstv %s1895_s7 }
  0x81   : > { %1896 = sst [smem:[#allocation18_spill]] %s1339_s15  ;;  %v215_v46 = vmul.f32 %v214_v37, %v1279_v0 }
  0x82   : > { %s1348_s6 = sld [smem:[#allocation2 + $0x85]]  ;;  %v273_v41 = vstv %s1897_s13 }
  0x83   : > { %1898 = sst [smem:[#allocation32_spill]] %s1343_s1  ;;  %v274_v50 = vmul.f32 %v273_v41, %v1345_v31 }
  0x84   : > { %s1900_s8 = sld [smem:[#allocation19_spill]] }
  0x85   : > { %s1353_s14 = sld [smem:[#allocation2 + $0x3c]]  ;;  %v275_v2 = vadd.f32 %v274_v50, %v271_v49  ;;  %v354_v49 = vmul.f32 %v353_v36, %v1334_v25 }
  0x86   : > { %s1358_s11 = sld [smem:[#allocation2 + $0x3d]]  ;;  %v224_v44 = vstv %s1899_s17 }
  0x87   : > { %s1901_s20 = sld [smem:[#allocation17_spill]]  ;;  %v225_v54 = vmul.f32 %v224_v44, %v1279_v0  ;;  %v355_v63 = vadd.f32 %v354_v49, %v351_v48 }
  0x88   : > { %s1361_s1 = sld [smem:[#allocation2 + $0x3e]] }
  0x89   : > { %s1902_s16 = sld [smem:[#allocation33_spill]] }
  0x8a   : > { %s1365_s21 = sld [smem:[#allocation2 + $0x3f]]  ;;  %v219_v47 = vstv %s1900_s8 }
  0x8b   : > { %s1903_s7 = sld [smem:[#allocation20_spill]]  ;;  %v220_v60 = vmul.f32 %v1291_v3, %v219_v47  ;;  %v390_v44 = vstv %s1353_s14 }
  0x8c   : > { %s1904_s15 = sld [smem:[#allocation22_spill]] }
  0x8d   : > { %s1905_s9 = sld [smem:[#allocation24_spill]]  ;;  %v216_v53 = vstv %s1901_s20 }
  0x8e   : > { %s1372_s13 = sld [smem:[#allocation2 + $0x40]]  ;;  %v217_v1 = vadd.f32 %v216_v53, %v215_v46 }
  0x8f   : > { %s1907_s28 = sld [smem:[#allocation27_spill]]  ;;  %v277_v55 = vstv %s1902_s16 }
  0x90   : > { %s1377_s17 = sld [smem:[#allocation2 + $0x41]]  ;;  %v278_v4 = vmul.f32 %v277_v55, %v1367_v45  ;;  %v1416_v19 = vadd.f32 %v220_v60, %v217_v1  ;;  %v327_v55 = vstv %s1284_s24  ;;  %v392_v60 = vstv %s1348_s6 }
  0x91   : > { %s1382_s5 = sld [smem:[#allocation2 + $0x42]]  ;;  %v226_v57 = vstv %s1903_s7  ;;  %v358_v1 = vmul.f32 %v357_v52, %v1345_v31  ;;  %v403_v33 = vstv %s1365_s21 }
  0x92   : > { %v229_v58 = vstv %s1904_s15  ;;  %s1909_s8 = sld [smem:[#allocation34_spill]]  ;;  %v227_v6 = vadd.f32 %v226_v57, %v225_v54  ;;  %v279_v20 = vadd.f32 %v278_v4, %v275_v2  ;;  %v391_v57 = vmul.f32 %v390_v44, %v1318_v16 }
  0x93   : > { %v234_v59 = vstv %s1905_s9  ;;  %s1910_s18 = sld [smem:[#allocation23_spill]]  ;;  %v230_v7 = vmul.f32 %v1291_v3, %v229_v58  ;;  %v359_v15 = vadd.f32 %v358_v1, %v355_v63 }
  0x94   : > { %1906 = sst [smem:[#allocation21_spill]] %s1372_s13  ;;  %v235_v8 = vmul.f32 %v234_v59, %v1279_v0 }
  0x95   : > { %s1389_s13 = sld [smem:[#allocation2 + $0x43]]  ;;  %v244_v61 = vstv %s1907_s28  ;;  %v1422_v23 = vadd.f32 %v230_v7, %v227_v6  ;;  %v328_v6 = vmul.f32 %v327_v55, %v1416_v19 }
  0x96   : > { %s1911_s23 = sld [smem:[#allocation25_spill]]  ;;  %v245_v12 = vmul.f32 %v244_v61, %v1279_v0  ;;  %v395_v61 = vstv %s1358_s11 }
  0x97   : > { %1908 = sst [smem:[#allocation19_spill]] %s1382_s5 }
  0x98   : > { %s1912_s20 = sld [smem:[#allocation26_spill]]  ;;  %v281_v9 = vstv %s1909_s8 }
  0x99   : > { %s1394_s16 = sld [smem:[#allocation2 + $0x44]]  ;;  %v236_v10 = vstv %s1910_s18  ;;  %v282_v21 = vmul.f32 %v281_v9, %v1384_v56  ;;  %v393_v9 = vadd.f32 %v392_v60, %v391_v57 }
  0x9a   : > { %s1913_s5 = sld [smem:[#allocation28_spill]]  ;;  %v237_v24 = vadd.f32 %v236_v10, %v235_v8  ;;  %v331_v8 = vstv %s1286_s25  ;;  %v396_v10 = vmul.f32 %v395_v61, %v1334_v25 }
  0x9b   : > { %s1398_s15 = sld [smem:[#allocation2 + $0x45]]  ;;  %v283_v37 = vadd.f32 %v282_v21, %v279_v20 }
  0x9c   : > { %s1403_s28 = sld [smem:[#allocation2 + $0x86]]  ;;  %v239_v11 = vstv %s1911_s23 }
  0x9d   : > { %s1915_s7 = sld [smem:[#allocation35_spill]]  ;;  %v240_v26 = vmul.f32 %v1291_v3, %v239_v11 }
  0x9e   : > { %v246_v13 = vstv %s1912_s20  ;;  %s1409_s9 = sld [smem:[#allocation2 + $0x46]] }
  0x9f   : > { %s1916_s10 = sld [smem:[#allocation30_spill]]  ;;  %v247_v28 = vadd.f32 %v246_v13, %v245_v12  ;;  %v1443_v41 = vadd.f32 %v240_v26, %v237_v24  ;;  %v399_v13 = vstv %s1361_s1  ;;  %v332_v24 = vmul.f32 %v331_v8, %v1422_v23 }
  0xa0   : > { %v249_v14 = vstv %s1913_s5  ;;  %s1420_s8 = sld [smem:[#allocation2 + $0x48]]  ;;  %v365_v26 = vstv %s1322_s30 }
  0xa1   : > { %1914 = sst [smem:[#allocation17_spill]] %s1398_s15  ;;  %v250_v29 = vmul.f32 %v1291_v3, %v249_v14 }
  0xa2   : > { %s1414_s15 = sld [smem:[#allocation2 + $0x47]]  ;;  %v434_v18 = vstv %s1403_s28 }
  0xa3   : > { %s1917_s5 = sld [smem:[#allocation36_spill]]  ;;  %v285_v27 = vstv %s1915_s7  ;;  %v1450_v46 = vadd.f32 %v250_v29, %v247_v28  ;;  %v335_v28 = vstv %s1289_s12  ;;  %v397_v29 = vadd.f32 %v396_v10, %v393_v9 }
  0xa4   : > { %s1426_s2 = sld [smem:[#allocation2 + $0x49]]  ;;  %v286_v38 = vmul.f32 %v285_v27, %v1416_v19  ;;  %v432_v2 = vstv %s1409_s9 }
  0xa5   : > { %s1918_s18 = sld [smem:[#allocation29_spill]]  ;;  %v254_v30 = vstv %s1916_s10  ;;  %v433_v14 = vmul.f32 %v432_v2, %v1318_v16  ;;  %v340_v48 = vmul.f32 %v339_v32, %v1450_v46 }
  0xa6   : > { %s1431_s0 = sld [smem:[#allocation2 + $0x4a]]  ;;  %v255_v42 = vmul.f32 %v254_v30, %v1279_v0  ;;  %v324_v0 = vmul.f32 %v323_v40, %v1384_v56  ;;  %v287_v53 = vadd.f32 %v286_v38, %v283_v37  ;;  %v400_v30 = vmul.f32 %v399_v13, %v1345_v31 }
  0xa7   : > { %s1919_s23 = sld [smem:[#allocation31_spill]]  ;;  %v435_v34 = vadd.f32 %v434_v18, %v433_v14  ;;  %v366_v38 = vmul.f32 %v365_v26, %v1384_v56 }
  0xa8   : > { %s1436_s20 = sld [smem:[#allocation2 + $0x4b]]  ;;  %v325_v5 = vadd.f32 %v324_v0, %v321_v51  ;;  %v437_v20 = vstv %s1414_s15  ;;  %v401_v49 = vadd.f32 %v400_v30, %v397_v29 }
  0xa9   : > { %v289_v39 = vstv %s1917_s5  ;;  %s1441_s7 = sld [smem:[#allocation2 + $0x4c]]  ;;  %v438_v35 = vmul.f32 %v437_v20, %v1334_v25 }
  0xaa   : > { %s1920_s10 = sld [smem:[#allocation37_spill]]  ;;  %v290_v50 = vmul.f32 %v289_v39, %v1422_v23  ;;  %v329_v22 = vadd.f32 %v328_v6, %v325_v5  ;;  %v441_v39 = vstv %s1420_s8  ;;  %v445_v57 = vstv %s1426_s2 }
  0xab   : > { %v256_v43 = vstv %s1918_s18  ;;  %s1448_s22 = sld [smem:[#allocation2 + $0x4d]]  ;;  %v439_v52 = vadd.f32 %v438_v35, %v435_v34  ;;  %v411_v6 = vstv %s1377_s17 }
  0xac   : > { %s1454_s27 = sld [smem:[#allocation2 + $0x4e]]  ;;  %v257_v58 = vadd.f32 %v256_v43, %v255_v42  ;;  %v291_v7 = vadd.f32 %v290_v50, %v287_v53  ;;  %v333_v40 = vadd.f32 %v332_v24, %v329_v22  ;;  %v336_v42 = vmul.f32 %v335_v28, %v1443_v41 }
  0xad   : > { %v259_v47 = vstv %s1919_s23  ;;  %s1921_s26 = sld [smem:[#allocation38_spill]]  ;;  %v369_v43 = vstv %s1325_s4  ;;  %v404_v50 = vmul.f32 %v403_v33, %v1367_v45  ;;  %v442_v53 = vmul.f32 %v441_v39, %v1345_v31 }
  0xae   : > { %s1459_s14 = sld [smem:[#allocation2 + $0x4f]]  ;;  %v260_v59 = vmul.f32 %v1291_v3, %v259_v47  ;;  %v361_v3 = vstv %s1316_s3  ;;  %v370_v55 = vmul.f32 %v369_v43, %v1416_v19  ;;  %v449_v9 = vstv %s1431_s0 }
  0xaf   : > { %s1464_s5 = sld [smem:[#allocation2 + $0x87]]  ;;  %v362_v17 = vmul.f32 %v361_v3, %v1367_v45  ;;  %v405_v2 = vadd.f32 %v404_v50, %v401_v49  ;;  %v443_v3 = vadd.f32 %v442_v53, %v439_v52  ;;  %v412_v20 = vmul.f32 %v411_v6, %v1416_v19 }
  0xb0   : > { %v293_v54 = vstv %s1920_s10  ;;  %s1469_s18 = sld [smem:[#allocation2 + $0x50]]  ;;  %v1485_v11 = vadd.f32 %v260_v59, %v257_v58  ;;  %v337_v59 = vadd.f32 %v336_v42, %v333_v40  ;;  %v450_v28 = vmul.f32 %v449_v9, %v1384_v56 }
  0xb1   : > { %s1474_s24 = sld [smem:[#allocation2 + $0x51]]  ;;  %v294_v4 = vmul.f32 %v293_v54, %v1443_v41  ;;  %v363_v37 = vadd.f32 %v362_v17, %v359_v15  ;;  %v453_v30 = vstv %s1436_s20  ;;  %v419_v39 = vstv %s1389_s13 }
  0xb2   : > { %s1479_s29 = sld [smem:[#allocation2 + $0x52]]  ;;  %v341_v14 = vadd.f32 %v340_v48, %v337_v59  ;;  %v457_v48 = vstv %s1441_s7  ;;  %v420_v52 = vmul.f32 %v419_v39, %v1443_v41 }
  0xb3   : > { %v297_v62 = vstv %s1921_s26  ;;  %s1922_s6 = sld [smem:[#allocation39_spill]]  ;;  %v295_v27 = vadd.f32 %v294_v4, %v291_v7  ;;  %v367_v54 = vadd.f32 %v366_v38, %v363_v37  ;;  %v446_v7 = vmul.f32 %v445_v57, %v1367_v45 }
  0xb4   : > { %s1483_s11 = sld [smem:[#allocation2 + $0x53]]  ;;  %v298_v12 = vmul.f32 %v297_v62, %v1450_v46  ;;  %v458_v59 = vmul.f32 %v457_v48, %v1422_v23 }
  0xb5   : > { %s1490_s3 = sld [smem:[#allocation2 + $0x54]]  ;;  %v476_v61 = vstv %s1464_s5  ;;  %v371_v8 = vadd.f32 %v370_v55, %v367_v54 }
  0xb6   : > { %s1495_s25 = sld [smem:[#allocation2 + $0x55]]  ;;  %v474_v44 = vstv %s1469_s18  ;;  %v299_v47 = vadd.f32 %v298_v12, %v295_v27  ;;  %v447_v27 = vadd.f32 %v446_v7, %v443_v3 }
  0xb7   : > { %s1500_s1 = sld [smem:[#allocation2 + $0x56]]  ;;  %v475_v58 = vmul.f32 %v474_v44, %v1318_v16  ;;  %v479_v62 = vstv %s1474_s24 }
  0xb8   : > { %s1504_s9 = sld [smem:[#allocation2 + $0x57]]  ;;  %v480_v12 = vmul.f32 %v479_v62, %v1334_v25  ;;  %v483_v17 = vstv %s1479_s29  ;;  %v451_v44 = vadd.f32 %v450_v28, %v447_v27  ;;  %v461_v62 = vstv %s1448_s22 }
  0xb9   : > { %v301_v21 = vstv %s1922_s6  ;;  %s1509_s15 = sld [smem:[#allocation2 + $0x58]]  ;;  %v477_v10 = vadd.f32 %v476_v61, %v475_v58  ;;  %v484_v33 = vmul.f32 %v483_v17, %v1345_v31  ;;  %v423_v58 = vstv %s1394_s16 }
  0xba   : > { %s1923_s30 = sld [smem:[#allocation41_spill]]  ;;  %v302_v36 = vmul.f32 %v301_v21, %v1485_v11 }
  0xbb   : > { %s1924_s28 = sld [smem:[#allocation21_spill]]  ;;  %v481_v32 = vadd.f32 %v480_v12, %v477_v10  ;;  %v491_v53 = vstv %s1490_s3  ;;  %v424_v10 = vmul.f32 %v423_v58, %v1450_v46 }
  0xbc   : > { %s1514_s12 = sld [smem:[#allocation2 + $0x59]]  ;;  %v1554_v13 = vadd.f32 %v302_v36, %v299_v47  ;;  %v487_v36 = vstv %s1483_s11  ;;  %v454_v47 = vmul.f32 %v453_v30, %v1416_v19  ;;  %v495_v7 = vstv %s1495_s25 }
  0xbd   : > { %s1519_s19 = sld [smem:[#allocation2 + $0x88]]  ;;  %v496_v27 = vmul.f32 %v495_v7, %v1416_v19 }
  0xbe   : > { %s1925_s21 = sld [smem:[#allocation40_spill]]  ;;  %v455_v61 = vadd.f32 %v454_v47, %v451_v44  ;;  %v469_v44 = vstv %s1459_s14 }
  0xbf   : > { %s1523_s8 = sld [smem:[#allocation2 + $0x5a]] }
  0xc0   : > { %v373_v51 = vstv %s1923_s30  ;;  %s1926_s23 = sld [smem:[#allocation42_spill]] }
  0xc1   : > { %v407_v0 = vstv %s1924_s28  ;;  %s1528_s4 = sld [smem:[#allocation2 + $0x5b]]  ;;  %v374_v63 = vmul.f32 %v373_v51, %v1422_v23  ;;  %v485_v51 = vadd.f32 %v484_v33, %v481_v32  ;;  %v503_v33 = vstv %s1504_s9 }
  0xc2   : > { %s1927_s10 = sld [smem:[#allocation18_spill]]  ;;  %v408_v4 = vmul.f32 %v407_v0, %v1384_v56  ;;  %v488_v0 = vmul.f32 %v487_v36, %v1367_v45 }
  0xc3   : > { %s1533_s26 = sld [smem:[#allocation2 + $0x5c]]  ;;  %v375_v29 = vadd.f32 %v374_v63, %v371_v8  ;;  %v518_v40 = vstv %s1519_s19 }
  0xc4   : > { %v343_v60 = vstv %s1925_s21  ;;  %s1538_s18 = sld [smem:[#allocation2 + $0x5d]]  ;;  %v409_v18 = vadd.f32 %v408_v4, %v405_v2  ;;  %v489_v2 = vadd.f32 %v488_v0, %v485_v51  ;;  %v492_v4 = vmul.f32 %v491_v53, %v1384_v56 }
  0xc5   : > { %s1543_s6 = sld [smem:[#allocation2 + $0x5e]]  ;;  %v344_v15 = vmul.f32 %v343_v60, %v1485_v11  ;;  %v516_v22 = vstv %s1523_s8 }
  0xc6   : > { %v377_v1 = vstv %s1926_s23  ;;  %s1928_s2 = sld [smem:[#allocation19_spill]]  ;;  %v517_v37 = vmul.f32 %v516_v22, %v1318_v16  ;;  %v413_v38 = vadd.f32 %v412_v20, %v409_v18  ;;  %v462_v20 = vmul.f32 %v461_v62, %v1443_v41 }
  0xc7   : > { %s1548_s5 = sld [smem:[#allocation2 + $0x5f]]  ;;  %v378_v24 = vmul.f32 %v377_v1, %v1443_v41  ;;  %v521_v42 = vstv %s1528_s4  ;;  %v1585_v43 = vadd.f32 %v344_v15, %v341_v14  ;;  %v459_v22 = vadd.f32 %v458_v59, %v455_v61 }
  0xc8   : > { %v381_v5 = vstv %s1927_s10  ;;  %s1552_s24 = sld [smem:[#allocation2 + $0x60]]  ;;  %v519_v54 = vadd.f32 %v518_v40, %v517_v37  ;;  %v522_v55 = vmul.f32 %v521_v42, %v1334_v25 }
  0xc9   : > { %s1558_s17 = sld [smem:[#allocation2 + $0x61]]  ;;  %v382_v26 = vmul.f32 %v381_v5, %v1450_v46  ;;  %v379_v49 = vadd.f32 %v378_v24, %v375_v29  ;;  %v525_v60 = vstv %s1533_s26  ;;  %v465_v24 = vstv %s1454_s27 }
  0xca   : > { %s1929_s30 = sld [smem:[#allocation32_spill]]  ;;  %v523_v8 = vadd.f32 %v522_v55, %v519_v54  ;;  %v526_v9 = vmul.f32 %v525_v60, %v1345_v31  ;;  %v529_v12 = vstv %s1538_s18  ;;  %v499_v29 = vstv %s1500_s1 }
  0xcb   : > { %s1563_s0 = sld [smem:[#allocation2 + $0x62]]  ;;  %v383_v3 = vadd.f32 %v382_v26, %v379_v49  ;;  %v493_v26 = vadd.f32 %v492_v4, %v489_v2  ;;  %v530_v32 = vmul.f32 %v529_v12, %v1367_v45  ;;  %v466_v39 = vmul.f32 %v465_v24, %v1450_v46 }
  0xcc   : > { %v415_v21 = vstv %s1928_s2  ;;  %s1568_s29 = sld [smem:[#allocation2 + $0x63]]  ;;  %v527_v30 = vadd.f32 %v526_v9, %v523_v8  ;;  %v463_v42 = vadd.f32 %v462_v20, %v459_v22  ;;  %v500_v48 = vmul.f32 %v499_v29, %v1422_v23 }
  0xcd   : > { %s1572_s28 = sld [smem:[#allocation2 + $0x89]]  ;;  %v416_v35 = vmul.f32 %v415_v21, %v1422_v23  ;;  %v497_v47 = vadd.f32 %v496_v27, %v493_v26  ;;  %v504_v49 = vmul.f32 %v503_v33, %v1443_v41  ;;  %v537_v0 = vstv %s1548_s5 }
  0xce   : > { %s1578_s21 = sld [smem:[#allocation2 + $0x64]]  ;;  %v538_v62 = vmul.f32 %v537_v0, %v1416_v19  ;;  %v541_v7 = vstv %s1552_s24  ;;  %v511_v20 = vstv %s1514_s12 }
  0xcf   : > { %s1583_s20 = sld [smem:[#allocation2 + $0x65]]  ;;  %v417_v57 = vadd.f32 %v416_v35, %v413_v38  ;;  %v501_v61 = vadd.f32 %v500_v48, %v497_v47  ;;  %v542_v24 = vmul.f32 %v541_v7, %v1422_v23  ;;  %v545_v26 = vstv %s1558_s17 }
  0xd0   : > { %v385_v34 = vstv %s1929_s30  ;;  %s1589_s11 = sld [smem:[#allocation2 + $0x66]] }
  0xd1   : > { %v386_v50 = vmul.f32 %v385_v34, %v1485_v11  ;;  %s1593_s13 = sld [smem:[#allocation2 + $0x67]]  ;;  %v421_v17 = vadd.f32 %v420_v52, %v417_v57  ;;  %v533_v34 = vstv %s1543_s6  ;;  %v507_v57 = vstv %s1509_s15 }
  0xd2   : > { %s1598_s7 = sld [smem:[#allocation2 + $0x68]]  ;;  %v534_v51 = vmul.f32 %v533_v34, %v1384_v56 }
  0xd3   : > { %s1603_s19 = sld [smem:[#allocation2 + $0x69]]  ;;  %v560_v1 = vstv %s1572_s28  ;;  %v1633_v28 = vadd.f32 %v386_v50, %v383_v3  ;;  %v425_v37 = vadd.f32 %v424_v10, %v421_v17  ;;  %v531_v50 = vadd.f32 %v530_v32, %v527_v30 }
  0xd4   : > { %v558_v63 = vstv %s1578_s21  ;;  %s1608_s3 = sld [smem:[#allocation2 + $0x6a]]  ;;  %v470_v3 = vmul.f32 %v469_v44, %v1485_v11  ;;  %v467_v10 = vadd.f32 %v466_v39, %v463_v42  ;;  %v505_v17 = vadd.f32 %v504_v49, %v501_v61 }
  0xd5   : > { %s1930_s8 = sld [smem:[#allocation17_spill]]  ;;  %v559_v5 = vmul.f32 %v558_v63, %v1318_v16  ;;  %v563_v6 = vstv %s1583_s20  ;;  %v535_v2 = vadd.f32 %v534_v51, %v531_v50 }
  0xd6   : > { %s1613_s16 = sld [smem:[#allocation2 + $0x6b]]  ;;  %v564_v15 = vmul.f32 %v563_v6, %v1334_v25  ;;  %v567_v21 = vstv %s1589_s11  ;;  %v1702_v34 = vadd.f32 %v470_v3, %v467_v10 }
  0xd7   : > { %s1617_s22 = sld [smem:[#allocation2 + $0x6c]]  ;;  %v561_v14 = vadd.f32 %v560_v1, %v559_v5  ;;  %v568_v36 = vmul.f32 %v567_v21, %v1345_v31  ;;  %v571_v40 = vstv %s1593_s13  ;;  %v539_v22 = vadd.f32 %v538_v62, %v535_v2 }
  0xd8   : > { %s1622_s23 = sld [smem:[#allocation2 + $0x6d]]  ;;  %v572_v53 = vmul.f32 %v571_v40, %v1367_v45  ;;  %v575_v58 = vstv %s1598_s7  ;;  %v549_v40 = vstv %s1563_s0 }
  0xd9   : > { %s1627_s25 = sld [smem:[#allocation2 + $0x8a]]  ;;  %v565_v35 = vadd.f32 %v564_v15, %v561_v14  ;;  %v576_v9 = vmul.f32 %v575_v58, %v1384_v56  ;;  %v579_v12 = vstv %s1603_s19  ;;  %v543_v44 = vadd.f32 %v542_v24, %v539_v22 }
  0xda   : > { %s1631_s4 = sld [smem:[#allocation2 + $0x6e]]  ;;  %v580_v32 = vmul.f32 %v579_v12, %v1416_v19  ;;  %v583_v33 = vstv %s1608_s3  ;;  %v550_v62 = vmul.f32 %v549_v40, %v1450_v46 }
  0xdb   : > { %v427_v18 = vstv %s1930_s8  ;;  %s1637_s10 = sld [smem:[#allocation2 + $0x6f]]  ;;  %v569_v52 = vadd.f32 %v568_v36, %v565_v35  ;;  %v1705_v35 = vmul.f32 %v511_v20, %v1485_v11  ;;  %v584_v47 = vmul.f32 %v583_v33, %v1422_v23 }
  0xdc   : > { %s1642_s27 = sld [smem:[#allocation2 + $0x70]]  ;;  %v428_v38 = vmul.f32 %v427_v18, %v1485_v11  ;;  %v508_v18 = vmul.f32 %v507_v57, %v1450_v46  ;;  %v587_v51 = vstv %s1613_s16 }
  0xdd   : > { %s1647_s1 = sld [smem:[#allocation2 + $0x71]]  ;;  %v573_v8 = vadd.f32 %v572_v53, %v569_v52  ;;  %v591_v2 = vstv %s1617_s22 }
  0xde   : > { %s1651_s9 = sld [smem:[#allocation2 + $0x72]]  ;;  %v1696_v29 = vadd.f32 %v428_v38, %v425_v37  ;;  %v1710_v37 = vadd.f32 %v508_v18, %v505_v17  ;;  %v546_v38 = vmul.f32 %v545_v26, %v1443_v41 }
  0xdf   : > { %s1656_s26 = sld [smem:[#allocation2 + $0x73]]  ;;  %v602_v55 = vstv %s1627_s25  ;;  %v577_v30 = vadd.f32 %v576_v9, %v573_v8  ;;  %v595_v8 = vstv %s1622_s23 }
  0xe0   : > { %v600_v54 = vstv %s1631_s4  ;;  %s1661_s14 = sld [smem:[#allocation2 + $0x74]]  ;;  %v596_v24 = vmul.f32 %v595_v8, %v1485_v11 }
  0xe1   : > { %v601_v59 = vmul.f32 %v600_v54, %v1318_v16  ;;  %v605_v60 = vstv %s1637_s10  ;;  %s1667_s18 = sld [smem:[#allocation2 + $0x75]]  ;;  %v581_v50 = vadd.f32 %v580_v32, %v577_v30 }
  0xe2   : > { %v606_v63 = vmul.f32 %v605_v60, %v1334_v25  ;;  %v609_v1 = vstv %s1642_s27  ;;  %s1672_s6 = sld [smem:[#allocation2 + $0x76]] }
  0xe3   : > { %v603_v4 = vadd.f32 %v602_v55, %v601_v59  ;;  %v610_v5 = vmul.f32 %v609_v1, %v1345_v31  ;;  %v613_v6 = vstv %s1647_s1  ;;  %s1676_s15 = sld [smem:[#allocation2 + $0x77]] }
  0xe4   : > { %s1681_s2 = sld [smem:[#allocation2 + $0x8b]]  ;;  %v614_v15 = vmul.f32 %v613_v6, %v1367_v45  ;;  %v617_v21 = vstv %s1651_s9 }
  0xe5   : > { %v607_v14 = vadd.f32 %v606_v63, %v603_v4  ;;  %s1685_s5 = sld [smem:[#allocation2 + $0x78]]  ;;  %v618_v39 = vmul.f32 %v617_v21, %v1384_v56  ;;  %v621_v42 = vstv %s1656_s26  ;;  %v553_v63 = vstv %s1568_s29 }
  0xe6   : > { %s1690_s24 = sld [smem:[#allocation2 + $0x79]]  ;;  %v622_v54 = vmul.f32 %v621_v42, %v1416_v19  ;;  %v625_v58 = vstv %s1661_s14 }
  0xe7   : > { %v611_v27 = vadd.f32 %v610_v5, %v607_v14  ;;  %s1694_s30 = sld [smem:[#allocation2 + $0x7a]]  ;;  %v585_v5 = vadd.f32 %v584_v47, %v581_v50  ;;  %v626_v3 = vmul.f32 %v625_v58, %v1422_v23  ;;  %v629_v9 = vstv %s1667_s18 }
  0xe8   : > { %s1700_s12 = sld [smem:[#allocation2 + $0x7b]]  ;;  %v633_v18 = vstv %s1672_s6 }
  0xe9   : > { %v615_v36 = vadd.f32 %v614_v15, %v611_v27  ;;  %s1708_s17 = sld [smem:[#allocation2 + $0x7c]]  ;;  %v592_v15 = vmul.f32 %v591_v2, %v1450_v46  ;;  %v630_v27 = vmul.f32 %v629_v9, %v1443_v41 }
  0xea   : > { %s1715_s28 = sld [smem:[#allocation2 + $0x7d]]  ;;  %v644_v49 = vstv %s1681_s2 }
  0xeb   : > { %v642_v48 = vstv %s1685_s5  ;;  %s1720_s21 = sld [smem:[#allocation2 + $0x7e]]  ;;  %v619_v53 = vadd.f32 %v618_v39, %v615_v36  ;;  %v634_v36 = vmul.f32 %v633_v18, %v1450_v46 }
  0xec   : > { %v643_v0 = vmul.f32 %v642_v48, %v1318_v16  ;;  %v647_v52 = vstv %s1690_s24  ;;  %s1725_s0 = sld [smem:[#allocation2 + $0x7f]]  ;;  %v547_v16 = vadd.f32 %v546_v38, %v543_v44 }
  0xed   : > { %v648_v55 = vmul.f32 %v647_v52, %v1334_v25  ;;  %v651_v57 = vstv %s1694_s30  ;;  %s1730_s20 = sld [smem:[#allocation2 + $0x80]]  ;;  %v588_v25 = vmul.f32 %v587_v51, %v1443_v41  ;;  %v623_v6 = vadd.f32 %v622_v54, %v619_v53 }
  0xee   : > { %v645_v59 = vadd.f32 %v644_v49, %v643_v0  ;;  %v652_v60 = vmul.f32 %v651_v57, %v1345_v31  ;;  %v655_v61 = vstv %s1700_s12  ;;  %s1735_s11 = sld [smem:[#allocation2 + $0x81]]  ;;  %v551_v14 = vadd.f32 %v550_v62, %v547_v16 }
  0xef   : > { %v659_v1 = vstv %s1708_s17  ;;  %s1740_s13 = sld [smem:[#allocation2 + $0x96]]  ;;  %v656_v31 = vmul.f32 %v655_v61, %v1367_v45  ;;  %v554_v45 = vmul.f32 %v553_v63, %v1485_v11  ;;  %v627_v26 = vadd.f32 %v626_v3, %v623_v6 }
  0xf0   : > { %v649_v4 = vadd.f32 %v648_v55, %v645_v59  ;;  %s1745_s7 = sld [smem:[#allocation2 + $0x8c]]  ;;  %v663_v7 = vstv %s1715_s28  ;;  %v660_v12 = vmul.f32 %v659_v1, %v1384_v56  ;;  %v589_v56 = vadd.f32 %v588_v25, %v585_v5 }
  0xf1   : > { %s1749_s29 = sld [smem:[#allocation2 + $0x8d]]  ;;  %v667_v17 = vstv %s1720_s21  ;;  %v664_v21 = vmul.f32 %v663_v7, %v1416_v19  ;;  %v637_v52 = vstv %s1676_s15  ;;  %v555_v57 = vadd.f32 %v554_v45, %v551_v14 }
  0xf2   : > { %v653_v10 = vadd.f32 %v652_v60, %v649_v4  ;;  %s1754_s19 = sld [smem:[#allocation2 + $0x8e]]  ;;  %v671_v22 = vstv %s1725_s0  ;;  %v668_v32 = vmul.f32 %v667_v17, %v1422_v23  ;;  %v631_v23 = vadd.f32 %v630_v27, %v627_v26 }
  0xf3   : > { %s1759_s3 = sld [smem:[#allocation2 + $0x8f]]  ;;  %v672_v39 = vmul.f32 %v671_v22, %v1443_v41  ;;  %v675_v44 = vstv %s1730_s20  ;;  %v593_v0 = vadd.f32 %v592_v15, %v589_v56  ;;  %v638_v61 = vmul.f32 %v637_v52, %v1485_v11 }
  0xf4   : > { %v657_v20 = vadd.f32 %v656_v31, %v653_v10  ;;  %s1764_s8 = sld [smem:[#allocation2 + $0x90]]  ;;  %v679_v58 = vstv %s1735_s11  ;;  %v635_v60 = vadd.f32 %v634_v36, %v631_v23 }
  0xf5   : > { %s1768_s16 = sld [smem:[#allocation2 + $0x91]]  ;;  %v686_v19 = vstv %s1740_s13 }
  0xf6   : > { %v661_v30 = vadd.f32 %v660_v12, %v657_v20  ;;  %v684_v33 = vstv %s1745_s7  ;;  %s1773_s22 = sld [smem:[#allocation2 + $0x92]]  ;;  %v639_v2 = vadd.f32 %v638_v61, %v635_v60 }
  0xf7   : > { %v685_v38 = vmul.f32 %v684_v33, %v1554_v13  ;;  %v689_v40 = vstv %s1749_s29  ;;  %s1782_s23 = sld [smem:[#allocation2 + $0x93]]  ;;  %v513_v13 = vadd.f32 %v1705_v35, %v1710_v37  ;;  %v597_v35 = vadd.f32 %v596_v24, %v593_v0 }
  0xf8   : > { %v665_v42 = vadd.f32 %v664_v21, %v661_v30  ;;  %v690_v47 = vmul.f32 %v689_v40, %v1585_v43  ;;  %v693_v48 = vstv %s1754_s19  ;;  %s1788_s25 = sld [smem:[#allocation2 + $0x94]]  ;;  %v676_v43 = vmul.f32 %v675_v44, %v1450_v46 }
  0xf9   : > { %v687_v49 = vadd.f32 %v686_v19, %v685_v38  ;;  %v694_v50 = vmul.f32 %v693_v48, %v1633_v28  ;;  %v697_v51 = vstv %s1759_s3  ;;  %s1931_s4 = sld [smem:[#allocation9_spill]] }
  0xfa   : > { %v669_v41 = vadd.f32 %v668_v32, %v665_v42  ;;  %v701_v53 = vstv %s1764_s8  ;;  %v698_v55 = vmul.f32 %v697_v51, %v1696_v29  ;;  %s975_s10 = sld [smem:[#allocation2 + $0x95]]  ;;  %v680_v29 = vmul.f32 %v679_v58, %v1485_v11 }
  0xfb   : > { %v691_v54 = vadd.f32 %v690_v47, %v687_v49  ;;  %v705_v59 = vstv %s1768_s16  ;;  %v702_v62 = vmul.f32 %v701_v53, %v1702_v34  ;;  %s1932_s1 = sld [smem:[#allocation16_spill]]  ;;  %v724_v11 = vlaneseq }
  0xfc   : > { %v673_v28 = vadd.f32 %v672_v39, %v669_v41  ;;  %v709_v37 = vstv %s1773_s22  ;;  %v706_v1 = vmul.f32 %v705_v59, %v513_v13  ;;  %s1933_s18 = sld [smem:[#allocation45_spill]] }
  0xfd   : > { %v695_v16 = vadd.f32 %v694_v50, %v691_v54  ;;  %v713_v25 = vstv %s1782_s23  ;;  %v710_v31 = vmul.f32 %v709_v37, %v555_v57  ;;  %vm726_vm0 = vcmp.lt.s32.totalorder %v724_v11, 256 }
  0xfe   : > { %v677_v46 = vadd.f32 %v676_v43, %v673_v28  ;;  %v717_v5 = vstv %s1788_s25  ;;  %v714_v7 = vmul.f32 %v713_v25, %v597_v35 }
  0xff   : > { %s149_s27 = sand.u32 1, %s1931_s4   ;;  %v699_v63 = vadd.f32 %v698_v55, %v695_v16  ;;  %v718_v9 = vmul.f32 %v717_v5, %v639_v2 }
 0x100   : > { %s822_s9 = sshll.u32 %s149_s27, 1  ;;  %v681_v6 = vadd.f32 %v680_v29, %v677_v46  ;;  %v721_v34 = vstv %s975_s10  ;;  %s730_s30 = scalar_lea.sflag [#allocation3], %s149_s27 }
 0x101   : > { %v703_v4 = vadd.f32 %v702_v62, %v699_v63  ;;  %s151_s2 = scalar_lea.vmem [#allocation5], %s822_s9 }
 0x102   : > { %s740_s6 = scalar_lea.hbm %s1933_s18, %s1932_s1  ;;  %v722_v12 = vmul.f32 %v721_v34, %v681_v6  ;;  %s742_s5 = sshll.u32 %s151_s2, 4  ;;  %s743_s5 = int_to_ptr.vmem [resolvable:$true] %s742_s5 }
 0x103   : > { %v707_v3 = vadd.f32 %v706_v1, %v703_v4  ;;  %s744_s24 = sshll.u32 %s740_s6, 4  ;;  %s1065_s0 = scalar_lea.hbm %s1933_s18, 4  ;;  %s745_s24 = int_to_ptr.hbm [resolvable:$true] %s744_s24 }
 0x104   : > { %s1059_s12 = sshra.s32 %s745_s24, 4  ;;  %s1060_s12 = int_to_ptr.hbm [resolvable:$true] %s1059_s12 }
 0x105   : > { %v711_v8 = vadd.f32 %v710_v31, %v707_v3  ;;  %s1061_s17 = scalar_lea.hbm %s1060_s12, 2  ;;  %p1066_p3 = scmp.lt.s32.totalorder %s1060_s12, %s1933_s18 }
 0x106   : > { %p1062_p0 = scmp.ne.s32.totalorder %s1060_s12, %s1061_s17  ;;  %p1067_p4 = scmp.lt.s32.totalorder %s1065_s0, %s1061_s17 }
 0x107   : > { %v715_v10 = vadd.f32 %v714_v7, %v711_v8 }
 0x108   : > { %p1063_p1 = pnand %p1062_p0, %p1164_p5  ;;  %p1068_p7 = por %p1067_p4, %p1066_p3 }
 0x109   : > { %v719_v14 = vadd.f32 %v718_v9, %v715_v10 }
 0x10a   : > { %p1064_p2 = pneg %p1063_p1 }
 0x10b   : > { %v723_v45 = vadd.f32 %v722_v12, %v719_v14 }
 0x10c   : > { %p1069_p8 = pnand %p1068_p7, %p1064_p2 }
 0x10d   : > { %728 = vst.msk [vmem:[%s151_s2] sm:$0x3] %vm726_vm0, %v723_v45 }
 0x10e   : > { %1072 = shalt.err (!%p1069_p8)
}
 0x10f   : > { %984 = dma.vmem_to_hbm [thread:$0]  (%p1164_p5), %s743_s5, 32, %s745_s24, %s730_s30  }
 0x110 PF: > { %s1935_s13 = sld [smem:[#allocation11_spill]] }
 0x111   : > { %s1936_s7 = sld [smem:[#allocation8_spill]] }
 0x116   : > { %p996_p9 = scmp.ge.s32.totalorder %s1935_s13, 2 }
 0x117   : > { %s756_s19 = sand.u32 1, %s1936_s7  }
 0x118   : > { %p991_p10 = pnand %p996_p9, %p1168_p6  ;;  %s757_s3 = scalar_lea.sflag [#allocation3], %s756_s19 }
 0x11a   : > { %p992_p11 = pneg %p991_p10 }
 0x11c   : > { %1094 = dma.done.wait (%p992_p11), %s757_s3, 32  }
 0x11d   : > { %1096 = vsyncadd (%p992_p11), %s757_s3, 4294967264  ;;  %s1938_s12 = sld [smem:[#allocation12_spill]] }
 0x11e   : > { %s1939_s9 = sld [smem:[#allocation9_spill]] }
 0x11f   : > { %s1940_s10 = sld [smem:[#allocation10_spill]] }
 0x120   : > { %s1941_s11 = sld [smem:[#allocation13_spill]] }
 0x123   : > { %p13_p12 = scmp.ge.s32.totalorder %s1938_s12, 4  }
 0x125   :  { %15 = sbr.rel (!%p13_p12) target bundleno = 8 (0x8), region = 69 }
 0x12a   :  { %763 = vsyncpa [#allocation3], 1 }
 0x12b   :  { %765 = vsyncpa [#allocation3 + $0x1], 1 }
 0x12c   :  { %766 = vsyncpa [#allocation4], 1 }
 0x12d   :  { %768 = vsyncpa [#allocation4 + $0x1], 1 }

</bundles_post_ra>
